<compile_context>
chip_gen: v6e
topology: v6e:2x2x1
jax: 0.10.0
libtpu: 0.0.40
codegen_flags: <defaults>
</compile_context>

<pallas_src>
import numpy as np
import jax
import jax.numpy as jnp
from jax.experimental import pallas as pl
from jax.experimental.pallas import tpu as pltpu


def _zero_pad_last2(p):
    """Zero-pad the last two dims of a 3-D array by 1 on each side (concat-based)."""
    b, r, c = p.shape
    zc = jnp.zeros((b, r, 1), p.dtype)
    p = jnp.concatenate([zc, p, zc], axis=2)
    zr = jnp.zeros((b, 1, c + 2), p.dtype)
    return jnp.concatenate([zr, p, zr], axis=1)


def _ccwh_kernel(x_ref, w1_ref, b1_ref, w2_ref, b2_ref, w3_ref, o_ref):
    x = x_ref[...].astype(jnp.float32)          # (Bt, C, W, H)
    Bt, C, W, H = x.shape

    # ---- branch C_H: SC on x permuted to (B, W, C, H) -----------------------
    # max/mean reduce over W; 3x3 conv acts on the (C, H) plane.
    p1_max = jnp.max(x, axis=2)                 # (Bt, C, H)
    p1_mean = jnp.mean(x, axis=2)               # (Bt, C, H)
    acc1 = jnp.zeros((Bt, C, H), jnp.float32) + b1_ref[0]
    for ch, plane in enumerate((p1_max, p1_mean)):
        pad = _zero_pad_last2(plane)            # (Bt, C+2, H+2)
        for di in range(3):
            for dj in range(3):
                tap = pad[:, di:di + C, dj:dj + H]          # plane[c+di-1, h+dj-1]
                acc1 = acc1 + w1_ref[ch * 9 + di * 3 + dj] * tap
    scale1 = jax.nn.sigmoid(acc1)               # (Bt, C, H), broadcast over W

    # ---- branch C_W: SC on x permuted to (B, H, W, C) -----------------------
    # max/mean reduce over H; 3x3 conv acts on the (W, C) plane.
    # scale2 kept in (C, W) layout => kernel taps transposed (C<->dj, W<->di).
    p2_max = jnp.max(x, axis=3)                 # (Bt, C, W)
    p2_mean = jnp.mean(x, axis=3)               # (Bt, C, W)
    acc2 = jnp.zeros((Bt, C, W), jnp.float32) + b2_ref[0]
    for ch, plane in enumerate((p2_max, p2_mean)):
        pad = _zero_pad_last2(plane)            # (Bt, C+2, W+2)
        for di in range(3):
            for dj in range(3):
                tap = pad[:, dj:dj + C, di:di + W]          # plane[c+dj-1, w+di-1]
                acc2 = acc2 + w2_ref[ch * 9 + di * 3 + dj] * tap
    scale2 = jax.nn.sigmoid(acc2)               # (Bt, C, W), broadcast over H

    # ---- branch C_C: channel attention (global avg pool + conv1d k=3) -------
    pooled = jnp.mean(p2_mean, axis=2, keepdims=True)        # (Bt, C, 1)
    zc = jnp.zeros((Bt, 1, 1), jnp.float32)
    padc = jnp.concatenate([zc, pooled, zc], axis=1)          # (Bt, C+2, 1)
    acc3 = jnp.zeros((Bt, C, 1), jnp.float32)
    for k in range(3):
        acc3 = acc3 + w3_ref[k] * padc[:, k:k + C, :]         # pooled[c+k-1]
    scale3 = jax.nn.sigmoid(acc3)               # (Bt, C, 1), broadcast over (W, H)

    factor = (0.5 * (scale1[:, :, None, :] + scale2[:, :, :, None])
              + scale3[:, :, :, None])
    o_ref[...] = (x * factor).astype(o_ref.dtype)


def ccwh_forward(x, w1, b1, w2, b2, w3, *, block_bytes_target=2 * 1024 * 1024):
    """x: (B,C,W,H); w1,w2: (1,2,3,3); b1,b2: (1,); w3: (1,1,3)."""
    B, C, W, H = x.shape
    w1f = w1.reshape(-1)   # (18,)
    w2f = w2.reshape(-1)   # (18,)
    w3f = w3.reshape(-1)   # (3,)

    def _rup(a, m):
        return (a + m - 1) // m * m

    # Per-batch-element VMEM footprint, accounting for (8,128) tile padding.
    itemsize = x.dtype.itemsize
    per_b = C * _rup(W, 8) * _rup(H, 128) * itemsize
    # Largest divisor of B whose x-block fits the target (amortize per-step cost).
    bt = 1
    for d in range(1, B + 1):
        if B % d == 0 and d * per_b <= block_bytes_target:
            bt = d
    grid = (B // bt,)

    # in + out, double-buffered, plus slack for the small intermediates.
    vmem_need = 4 * bt * per_b + (1 << 20)
    cp_kwargs = dict(dimension_semantics=("parallel",))
    if vmem_need > 32 * 1024 * 1024:
        cp_kwargs["vmem_limit_bytes"] = int(min(vmem_need, 100 * 1024 * 1024))
    compiler_params = pltpu.CompilerParams(**cp_kwargs)

    n = B * C * W * H
    cost = pl.CostEstimate(
        flops=int(4 * n + 2 * 36 * B * C * (W + H)),   # elementwise apply + conv taps
        transcendentals=int(B * C * (W + H + 1)),      # sigmoids
        bytes_accessed=int(2 * n * itemsize),          # memory-bound: read x, write out
    )

    return pl.pallas_call(
        _ccwh_kernel,
        out_shape=jax.ShapeDtypeStruct((B, C, W, H), x.dtype),
        grid=grid,
        in_specs=[
            pl.BlockSpec((bt, C, W, H), lambda b: (b, 0, 0, 0)),
            pl.BlockSpec(memory_space=pltpu.MemorySpace.SMEM),
            pl.BlockSpec(memory_space=pltpu.MemorySpace.SMEM),
            pl.BlockSpec(memory_space=pltpu.MemorySpace.SMEM),
            pl.BlockSpec(memory_space=pltpu.MemorySpace.SMEM),
            pl.BlockSpec(memory_space=pltpu.MemorySpace.SMEM),
        ],
        out_specs=pl.BlockSpec((bt, C, W, H), lambda b: (b, 0, 0, 0)),
        compiler_params=compiler_params,
        cost_estimate=cost,
    )(x, w1f, b1, w2f, b2, w3f)


def ccwh_reference(x, w1, b1, w2, b2, w3):
    """Pure-JAX emulation of the PyTorch module (for correctness checking)."""
    def sc(xp, w, b):
        mx = jnp.max(xp, axis=1, keepdims=True)
        mn = jnp.mean(xp, axis=1, keepdims=True)
        comp = jnp.concatenate([mx, mn], axis=1)
        out = jax.lax.conv_general_dilated(
            comp, w, window_strides=(1, 1), padding="SAME",
            dimension_numbers=("NCHW", "OIHW", "NCHW"))
        out = out + b.reshape(1, 1, 1, 1)
        return xp * jax.nn.sigmoid(out)

    xp1 = jnp.transpose(x, (0, 2, 1, 3))                 # b c w h -> b w c h
    o11 = jnp.transpose(sc(xp1, w1, b1), (0, 2, 1, 3))
    xp2 = jnp.transpose(x, (0, 3, 2, 1))                 # b c w h -> b h w c
    o21 = jnp.transpose(sc(xp2, w2, b2), (0, 3, 2, 1))

    y = jnp.mean(x, axis=(2, 3))                         # (B, C) adaptive avg pool
    yc = jax.lax.conv_general_dilated(
        y[:, None, :], w3, window_strides=(1,), padding="SAME",
        dimension_numbers=("NCH", "OIH", "NCH"))
    s3 = jax.nn.sigmoid(yc[:, 0, :])
    o3 = x * s3[:, :, None, None]
    return 0.5 * (o11 + o21) + o3


if __name__ == "__main__":
    key = jax.random.PRNGKey(0)
    kx, k1, kb1, k2, kb2, k3 = jax.random.split(key, 6)
    B, C, W, H = 2, 4, 16, 16
    x = jax.random.normal(kx, (B, C, W, H), jnp.float32)
    # Deterministic synthetic parameters (shapes from the module __init__).
    w1 = 0.3 * jax.random.normal(k1, (1, 2, 3, 3), jnp.float32)   # C_H.spatial weight
    b1 = 0.1 * jax.random.normal(kb1, (1,), jnp.float32)          # C_H.spatial bias
    w2 = 0.3 * jax.random.normal(k2, (1, 2, 3, 3), jnp.float32)   # C_W.spatial weight
    b2 = 0.1 * jax.random.normal(kb2, (1,), jnp.float32)          # C_W.spatial bias
    w3 = 0.5 * jax.random.normal(k3, (1, 1, 3), jnp.float32)      # C_C.conv weight (no bias)

    out = jax.block_until_ready(ccwh_forward(x, w1, b1, w2, b2, w3))
    ref = ccwh_reference(x, w1, b1, w2, b2, w3)
    np.testing.assert_allclose(np.asarray(out), np.asarray(ref), rtol=1e-5, atol=1e-5)
    print("KERNEL_OK")
</pallas_src>

<mosaic_0001>
module attributes {stable_mosaic.version = 11 : i64} {
  func.func @_ccwh_kernel(%arg0: i32, %arg1: memref<2x4x16x16xf32, #tpu.memory_space<vmem>>, %arg2: memref<18xf32, #tpu.memory_space<smem>>, %arg3: memref<1xf32, #tpu.memory_space<smem>>, %arg4: memref<18xf32, #tpu.memory_space<smem>>, %arg5: memref<1xf32, #tpu.memory_space<smem>>, %arg6: memref<3xf32, #tpu.memory_space<smem>>, %arg7: memref<2x4x16x16xf32, #tpu.memory_space<vmem>>) attributes {dimension_semantics = [#tpu.dimension_semantics<parallel>], iteration_bounds = array<i64: 1>, scalar_prefetch = 0 : i64, scratch_operands = 0 : i64, tpu.core_type = #tpu.core_type<tc>, window_params = [{transform_indices = @transform_0, window_bounds = array<i64: 2, 4, 16, 16>}, {transform_indices = @transform_1, window_bounds = array<i64: 18>}, {transform_indices = @transform_2, window_bounds = array<i64: 1>}, {transform_indices = @transform_3, window_bounds = array<i64: 18>}, {transform_indices = @transform_4, window_bounds = array<i64: 1>}, {transform_indices = @transform_5, window_bounds = array<i64: 3>}, {transform_indices = @transform_6, window_bounds = array<i64: 2, 4, 16, 16>}]} {
    %c0 = arith.constant 0 : index
    %c0_0 = arith.constant 0 : index
    %c0_1 = arith.constant 0 : index
    %c0_2 = arith.constant 0 : index
    %0 = vector.load %arg1[%c0, %c0_0, %c0_1, %c0_2] : memref<2x4x16x16xf32, #tpu.memory_space<vmem>>, vector<2x4x16x16xf32>
    %cst = arith.constant dense<0xFF800000> : vector<2x4x16xf32>
    %1 = vector.multi_reduction <maximumf>, %0, %cst [2] : vector<2x4x16x16xf32> to vector<2x4x16xf32>
    %cst_3 = arith.constant dense<0.000000e+00> : vector<2x4x16xf32>
    %2 = vector.multi_reduction <add>, %0, %cst_3 [2] : vector<2x4x16x16xf32> to vector<2x4x16xf32>
    %cst_4 = arith.constant 1.600000e+01 : f32
    %3 = vector.broadcast %cst_4 : f32 to vector<2x4x16xf32>
    %4 = arith.divf %2, %3 : vector<2x4x16xf32>
    %cst_5 = arith.constant 0.000000e+00 : f32
    %5 = vector.broadcast %cst_5 : f32 to vector<2x4x16xf32>
    %c0_6 = arith.constant 0 : index
    %6 = memref.load %arg3[%c0_6] : memref<1xf32, #tpu.memory_space<smem>>
    %7 = vector.broadcast %6 : f32 to vector<2x4x16xf32>
    %8 = arith.addf %5, %7 : vector<2x4x16xf32>
    %cst_7 = arith.constant 0.000000e+00 : f32
    %9 = vector.broadcast %cst_7 : f32 to vector<2x4x1xf32>
    %10 = tpu.concatenate %9, %1, %9 in 2 : vector<2x4x1xf32>, vector<2x4x16xf32>, vector<2x4x1xf32> -> vector<2x4x18xf32>
    %cst_8 = arith.constant 0.000000e+00 : f32
    %11 = vector.broadcast %cst_8 : f32 to vector<2x1x18xf32>
    %12 = tpu.concatenate %11, %10, %11 in 1 : vector<2x1x18xf32>, vector<2x4x18xf32>, vector<2x1x18xf32> -> vector<2x6x18xf32>
    %13 = vector.extract_strided_slice %12 {offsets = [0, 0, 0], sizes = [2, 4, 16], strides = [1, 1, 1]} : vector<2x6x18xf32> to vector<2x4x16xf32>
    %c0_9 = arith.constant 0 : index
    %14 = memref.load %arg2[%c0_9] : memref<18xf32, #tpu.memory_space<smem>>
    %15 = vector.broadcast %14 : f32 to vector<2x4x16xf32>
    %16 = arith.mulf %15, %13 : vector<2x4x16xf32>
    %17 = arith.addf %8, %16 : vector<2x4x16xf32>
    %18 = vector.extract_strided_slice %12 {offsets = [0, 0, 1], sizes = [2, 4, 16], strides = [1, 1, 1]} : vector<2x6x18xf32> to vector<2x4x16xf32>
    %c1 = arith.constant 1 : index
    %19 = memref.load %arg2[%c1] : memref<18xf32, #tpu.memory_space<smem>>
    %20 = vector.broadcast %19 : f32 to vector<2x4x16xf32>
    %21 = arith.mulf %20, %18 : vector<2x4x16xf32>
    %22 = arith.addf %17, %21 : vector<2x4x16xf32>
    %23 = vector.extract_strided_slice %12 {offsets = [0, 0, 2], sizes = [2, 4, 16], strides = [1, 1, 1]} : vector<2x6x18xf32> to vector<2x4x16xf32>
    %c2 = arith.constant 2 : index
    %24 = memref.load %arg2[%c2] : memref<18xf32, #tpu.memory_space<smem>>
    %25 = vector.broadcast %24 : f32 to vector<2x4x16xf32>
    %26 = arith.mulf %25, %23 : vector<2x4x16xf32>
    %27 = arith.addf %22, %26 : vector<2x4x16xf32>
    %28 = vector.extract_strided_slice %12 {offsets = [0, 1, 0], sizes = [2, 4, 16], strides = [1, 1, 1]} : vector<2x6x18xf32> to vector<2x4x16xf32>
    %c3 = arith.constant 3 : index
    %29 = memref.load %arg2[%c3] : memref<18xf32, #tpu.memory_space<smem>>
    %30 = vector.broadcast %29 : f32 to vector<2x4x16xf32>
    %31 = arith.mulf %30, %28 : vector<2x4x16xf32>
    %32 = arith.addf %27, %31 : vector<2x4x16xf32>
    %33 = vector.extract_strided_slice %12 {offsets = [0, 1, 1], sizes = [2, 4, 16], strides = [1, 1, 1]} : vector<2x6x18xf32> to vector<2x4x16xf32>
    %c4 = arith.constant 4 : index
    %34 = memref.load %arg2[%c4] : memref<18xf32, #tpu.memory_space<smem>>
    %35 = vector.broadcast %34 : f32 to vector<2x4x16xf32>
    %36 = arith.mulf %35, %33 : vector<2x4x16xf32>
    %37 = arith.addf %32, %36 : vector<2x4x16xf32>
    %38 = vector.extract_strided_slice %12 {offsets = [0, 1, 2], sizes = [2, 4, 16], strides = [1, 1, 1]} : vector<2x6x18xf32> to vector<2x4x16xf32>
    %c5 = arith.constant 5 : index
    %39 = memref.load %arg2[%c5] : memref<18xf32, #tpu.memory_space<smem>>
    %40 = vector.broadcast %39 : f32 to vector<2x4x16xf32>
    %41 = arith.mulf %40, %38 : vector<2x4x16xf32>
    %42 = arith.addf %37, %41 : vector<2x4x16xf32>
    %43 = vector.extract_strided_slice %12 {offsets = [0, 2, 0], sizes = [2, 4, 16], strides = [1, 1, 1]} : vector<2x6x18xf32> to vector<2x4x16xf32>
    %c6 = arith.constant 6 : index
    %44 = memref.load %arg2[%c6] : memref<18xf32, #tpu.memory_space<smem>>
    %45 = vector.broadcast %44 : f32 to vector<2x4x16xf32>
    %46 = arith.mulf %45, %43 : vector<2x4x16xf32>
    %47 = arith.addf %42, %46 : vector<2x4x16xf32>
    %48 = vector.extract_strided_slice %12 {offsets = [0, 2, 1], sizes = [2, 4, 16], strides = [1, 1, 1]} : vector<2x6x18xf32> to vector<2x4x16xf32>
    %c7 = arith.constant 7 : index
    %49 = memref.load %arg2[%c7] : memref<18xf32, #tpu.memory_space<smem>>
    %50 = vector.broadcast %49 : f32 to vector<2x4x16xf32>
    %51 = arith.mulf %50, %48 : vector<2x4x16xf32>
    %52 = arith.addf %47, %51 : vector<2x4x16xf32>
    %53 = vector.extract_strided_slice %12 {offsets = [0, 2, 2], sizes = [2, 4, 16], strides = [1, 1, 1]} : vector<2x6x18xf32> to vector<2x4x16xf32>
    %c8 = arith.constant 8 : index
    %54 = memref.load %arg2[%c8] : memref<18xf32, #tpu.memory_space<smem>>
    %55 = vector.broadcast %54 : f32 to vector<2x4x16xf32>
    %56 = arith.mulf %55, %53 : vector<2x4x16xf32>
    %57 = arith.addf %52, %56 : vector<2x4x16xf32>
    %cst_10 = arith.constant 0.000000e+00 : f32
    %58 = vector.broadcast %cst_10 : f32 to vector<2x4x1xf32>
    %59 = tpu.concatenate %58, %4, %58 in 2 : vector<2x4x1xf32>, vector<2x4x16xf32>, vector<2x4x1xf32> -> vector<2x4x18xf32>
    %cst_11 = arith.constant 0.000000e+00 : f32
    %60 = vector.broadcast %cst_11 : f32 to vector<2x1x18xf32>
    %61 = tpu.concatenate %60, %59, %60 in 1 : vector<2x1x18xf32>, vector<2x4x18xf32>, vector<2x1x18xf32> -> vector<2x6x18xf32>
    %62 = vector.extract_strided_slice %61 {offsets = [0, 0, 0], sizes = [2, 4, 16], strides = [1, 1, 1]} : vector<2x6x18xf32> to vector<2x4x16xf32>
    %c9 = arith.constant 9 : index
    %63 = memref.load %arg2[%c9] : memref<18xf32, #tpu.memory_space<smem>>
    %64 = vector.broadcast %63 : f32 to vector<2x4x16xf32>
    %65 = arith.mulf %64, %62 : vector<2x4x16xf32>
    %66 = arith.addf %57, %65 : vector<2x4x16xf32>
    %67 = vector.extract_strided_slice %61 {offsets = [0, 0, 1], sizes = [2, 4, 16], strides = [1, 1, 1]} : vector<2x6x18xf32> to vector<2x4x16xf32>
    %c10 = arith.constant 10 : index
    %68 = memref.load %arg2[%c10] : memref<18xf32, #tpu.memory_space<smem>>
    %69 = vector.broadcast %68 : f32 to vector<2x4x16xf32>
    %70 = arith.mulf %69, %67 : vector<2x4x16xf32>
    %71 = arith.addf %66, %70 : vector<2x4x16xf32>
    %72 = vector.extract_strided_slice %61 {offsets = [0, 0, 2], sizes = [2, 4, 16], strides = [1, 1, 1]} : vector<2x6x18xf32> to vector<2x4x16xf32>
    %c11 = arith.constant 11 : index
    %73 = memref.load %arg2[%c11] : memref<18xf32, #tpu.memory_space<smem>>
    %74 = vector.broadcast %73 : f32 to vector<2x4x16xf32>
    %75 = arith.mulf %74, %72 : vector<2x4x16xf32>
    %76 = arith.addf %71, %75 : vector<2x4x16xf32>
    %77 = vector.extract_strided_slice %61 {offsets = [0, 1, 0], sizes = [2, 4, 16], strides = [1, 1, 1]} : vector<2x6x18xf32> to vector<2x4x16xf32>
    %c12 = arith.constant 12 : index
    %78 = memref.load %arg2[%c12] : memref<18xf32, #tpu.memory_space<smem>>
    %79 = vector.broadcast %78 : f32 to vector<2x4x16xf32>
    %80 = arith.mulf %79, %77 : vector<2x4x16xf32>
    %81 = arith.addf %76, %80 : vector<2x4x16xf32>
    %82 = vector.extract_strided_slice %61 {offsets = [0, 1, 1], sizes = [2, 4, 16], strides = [1, 1, 1]} : vector<2x6x18xf32> to vector<2x4x16xf32>
    %c13 = arith.constant 13 : index
    %83 = memref.load %arg2[%c13] : memref<18xf32, #tpu.memory_space<smem>>
    %84 = vector.broadcast %83 : f32 to vector<2x4x16xf32>
    %85 = arith.mulf %84, %82 : vector<2x4x16xf32>
    %86 = arith.addf %81, %85 : vector<2x4x16xf32>
    %87 = vector.extract_strided_slice %61 {offsets = [0, 1, 2], sizes = [2, 4, 16], strides = [1, 1, 1]} : vector<2x6x18xf32> to vector<2x4x16xf32>
    %c14 = arith.constant 14 : index
    %88 = memref.load %arg2[%c14] : memref<18xf32, #tpu.memory_space<smem>>
    %89 = vector.broadcast %88 : f32 to vector<2x4x16xf32>
    %90 = arith.mulf %89, %87 : vector<2x4x16xf32>
    %91 = arith.addf %86, %90 : vector<2x4x16xf32>
    %92 = vector.extract_strided_slice %61 {offsets = [0, 2, 0], sizes = [2, 4, 16], strides = [1, 1, 1]} : vector<2x6x18xf32> to vector<2x4x16xf32>
    %c15 = arith.constant 15 : index
    %93 = memref.load %arg2[%c15] : memref<18xf32, #tpu.memory_space<smem>>
    %94 = vector.broadcast %93 : f32 to vector<2x4x16xf32>
    %95 = arith.mulf %94, %92 : vector<2x4x16xf32>
    %96 = arith.addf %91, %95 : vector<2x4x16xf32>
    %97 = vector.extract_strided_slice %61 {offsets = [0, 2, 1], sizes = [2, 4, 16], strides = [1, 1, 1]} : vector<2x6x18xf32> to vector<2x4x16xf32>
    %c16 = arith.constant 16 : index
    %98 = memref.load %arg2[%c16] : memref<18xf32, #tpu.memory_space<smem>>
    %99 = vector.broadcast %98 : f32 to vector<2x4x16xf32>
    %100 = arith.mulf %99, %97 : vector<2x4x16xf32>
    %101 = arith.addf %96, %100 : vector<2x4x16xf32>
    %102 = vector.extract_strided_slice %61 {offsets = [0, 2, 2], sizes = [2, 4, 16], strides = [1, 1, 1]} : vector<2x6x18xf32> to vector<2x4x16xf32>
    %c17 = arith.constant 17 : index
    %103 = memref.load %arg2[%c17] : memref<18xf32, #tpu.memory_space<smem>>
    %104 = vector.broadcast %103 : f32 to vector<2x4x16xf32>
    %105 = arith.mulf %104, %102 : vector<2x4x16xf32>
    %106 = arith.addf %101, %105 : vector<2x4x16xf32>
    %107 = arith.negf %106 : vector<2x4x16xf32>
    %108 = math.exp %107 : vector<2x4x16xf32>
    %cst_12 = arith.constant 1.000000e+00 : f32
    %109 = vector.broadcast %cst_12 : f32 to vector<2x4x16xf32>
    %110 = arith.addf %109, %108 : vector<2x4x16xf32>
    %111 = arith.divf %109, %110 : vector<2x4x16xf32>
    %cst_13 = arith.constant dense<0xFF800000> : vector<2x4x16xf32>
    %112 = vector.multi_reduction <maximumf>, %0, %cst_13 [3] : vector<2x4x16x16xf32> to vector<2x4x16xf32>
    %cst_14 = arith.constant dense<0.000000e+00> : vector<2x4x16xf32>
    %113 = vector.multi_reduction <add>, %0, %cst_14 [3] : vector<2x4x16x16xf32> to vector<2x4x16xf32>
    %cst_15 = arith.constant 1.600000e+01 : f32
    %114 = vector.broadcast %cst_15 : f32 to vector<2x4x16xf32>
    %115 = arith.divf %113, %114 : vector<2x4x16xf32>
    %cst_16 = arith.constant 0.000000e+00 : f32
    %116 = vector.broadcast %cst_16 : f32 to vector<2x4x16xf32>
    %c0_17 = arith.constant 0 : index
    %117 = memref.load %arg5[%c0_17] : memref<1xf32, #tpu.memory_space<smem>>
    %118 = vector.broadcast %117 : f32 to vector<2x4x16xf32>
    %119 = arith.addf %116, %118 : vector<2x4x16xf32>
    %cst_18 = arith.constant 0.000000e+00 : f32
    %120 = vector.broadcast %cst_18 : f32 to vector<2x4x1xf32>
    %121 = tpu.concatenate %120, %112, %120 in 2 : vector<2x4x1xf32>, vector<2x4x16xf32>, vector<2x4x1xf32> -> vector<2x4x18xf32>
    %cst_19 = arith.constant 0.000000e+00 : f32
    %122 = vector.broadcast %cst_19 : f32 to vector<2x1x18xf32>
    %123 = tpu.concatenate %122, %121, %122 in 1 : vector<2x1x18xf32>, vector<2x4x18xf32>, vector<2x1x18xf32> -> vector<2x6x18xf32>
    %124 = vector.extract_strided_slice %123 {offsets = [0, 0, 0], sizes = [2, 4, 16], strides = [1, 1, 1]} : vector<2x6x18xf32> to vector<2x4x16xf32>
    %c0_20 = arith.constant 0 : index
    %125 = memref.load %arg4[%c0_20] : memref<18xf32, #tpu.memory_space<smem>>
    %126 = vector.broadcast %125 : f32 to vector<2x4x16xf32>
    %127 = arith.mulf %126, %124 : vector<2x4x16xf32>
    %128 = arith.addf %119, %127 : vector<2x4x16xf32>
    %129 = vector.extract_strided_slice %123 {offsets = [0, 1, 0], sizes = [2, 4, 16], strides = [1, 1, 1]} : vector<2x6x18xf32> to vector<2x4x16xf32>
    %c1_21 = arith.constant 1 : index
    %130 = memref.load %arg4[%c1_21] : memref<18xf32, #tpu.memory_space<smem>>
    %131 = vector.broadcast %130 : f32 to vector<2x4x16xf32>
    %132 = arith.mulf %131, %129 : vector<2x4x16xf32>
    %133 = arith.addf %128, %132 : vector<2x4x16xf32>
    %134 = vector.extract_strided_slice %123 {offsets = [0, 2, 0], sizes = [2, 4, 16], strides = [1, 1, 1]} : vector<2x6x18xf32> to vector<2x4x16xf32>
    %c2_22 = arith.constant 2 : index
    %135 = memref.load %arg4[%c2_22] : memref<18xf32, #tpu.memory_space<smem>>
    %136 = vector.broadcast %135 : f32 to vector<2x4x16xf32>
    %137 = arith.mulf %136, %134 : vector<2x4x16xf32>
    %138 = arith.addf %133, %137 : vector<2x4x16xf32>
    %139 = vector.extract_strided_slice %123 {offsets = [0, 0, 1], sizes = [2, 4, 16], strides = [1, 1, 1]} : vector<2x6x18xf32> to vector<2x4x16xf32>
    %c3_23 = arith.constant 3 : index
    %140 = memref.load %arg4[%c3_23] : memref<18xf32, #tpu.memory_space<smem>>
    %141 = vector.broadcast %140 : f32 to vector<2x4x16xf32>
    %142 = arith.mulf %141, %139 : vector<2x4x16xf32>
    %143 = arith.addf %138, %142 : vector<2x4x16xf32>
    %144 = vector.extract_strided_slice %123 {offsets = [0, 1, 1], sizes = [2, 4, 16], strides = [1, 1, 1]} : vector<2x6x18xf32> to vector<2x4x16xf32>
    %c4_24 = arith.constant 4 : index
    %145 = memref.load %arg4[%c4_24] : memref<18xf32, #tpu.memory_space<smem>>
    %146 = vector.broadcast %145 : f32 to vector<2x4x16xf32>
    %147 = arith.mulf %146, %144 : vector<2x4x16xf32>
    %148 = arith.addf %143, %147 : vector<2x4x16xf32>
    %149 = vector.extract_strided_slice %123 {offsets = [0, 2, 1], sizes = [2, 4, 16], strides = [1, 1, 1]} : vector<2x6x18xf32> to vector<2x4x16xf32>
    %c5_25 = arith.constant 5 : index
    %150 = memref.load %arg4[%c5_25] : memref<18xf32, #tpu.memory_space<smem>>
    %151 = vector.broadcast %150 : f32 to vector<2x4x16xf32>
    %152 = arith.mulf %151, %149 : vector<2x4x16xf32>
    %153 = arith.addf %148, %152 : vector<2x4x16xf32>
    %154 = vector.extract_strided_slice %123 {offsets = [0, 0, 2], sizes = [2, 4, 16], strides = [1, 1, 1]} : vector<2x6x18xf32> to vector<2x4x16xf32>
    %c6_26 = arith.constant 6 : index
    %155 = memref.load %arg4[%c6_26] : memref<18xf32, #tpu.memory_space<smem>>
    %156 = vector.broadcast %155 : f32 to vector<2x4x16xf32>
    %157 = arith.mulf %156, %154 : vector<2x4x16xf32>
    %158 = arith.addf %153, %157 : vector<2x4x16xf32>
    %159 = vector.extract_strided_slice %123 {offsets = [0, 1, 2], sizes = [2, 4, 16], strides = [1, 1, 1]} : vector<2x6x18xf32> to vector<2x4x16xf32>
    %c7_27 = arith.constant 7 : index
    %160 = memref.load %arg4[%c7_27] : memref<18xf32, #tpu.memory_space<smem>>
    %161 = vector.broadcast %160 : f32 to vector<2x4x16xf32>
    %162 = arith.mulf %161, %159 : vector<2x4x16xf32>
    %163 = arith.addf %158, %162 : vector<2x4x16xf32>
    %164 = vector.extract_strided_slice %123 {offsets = [0, 2, 2], sizes = [2, 4, 16], strides = [1, 1, 1]} : vector<2x6x18xf32> to vector<2x4x16xf32>
    %c8_28 = arith.constant 8 : index
    %165 = memref.load %arg4[%c8_28] : memref<18xf32, #tpu.memory_space<smem>>
    %166 = vector.broadcast %165 : f32 to vector<2x4x16xf32>
    %167 = arith.mulf %166, %164 : vector<2x4x16xf32>
    %168 = arith.addf %163, %167 : vector<2x4x16xf32>
    %cst_29 = arith.constant 0.000000e+00 : f32
    %169 = vector.broadcast %cst_29 : f32 to vector<2x4x1xf32>
    %170 = tpu.concatenate %169, %115, %169 in 2 : vector<2x4x1xf32>, vector<2x4x16xf32>, vector<2x4x1xf32> -> vector<2x4x18xf32>
    %cst_30 = arith.constant 0.000000e+00 : f32
    %171 = vector.broadcast %cst_30 : f32 to vector<2x1x18xf32>
    %172 = tpu.concatenate %171, %170, %171 in 1 : vector<2x1x18xf32>, vector<2x4x18xf32>, vector<2x1x18xf32> -> vector<2x6x18xf32>
    %173 = vector.extract_strided_slice %172 {offsets = [0, 0, 0], sizes = [2, 4, 16], strides = [1, 1, 1]} : vector<2x6x18xf32> to vector<2x4x16xf32>
    %c9_31 = arith.constant 9 : index
    %174 = memref.load %arg4[%c9_31] : memref<18xf32, #tpu.memory_space<smem>>
    %175 = vector.broadcast %174 : f32 to vector<2x4x16xf32>
    %176 = arith.mulf %175, %173 : vector<2x4x16xf32>
    %177 = arith.addf %168, %176 : vector<2x4x16xf32>
    %178 = vector.extract_strided_slice %172 {offsets = [0, 1, 0], sizes = [2, 4, 16], strides = [1, 1, 1]} : vector<2x6x18xf32> to vector<2x4x16xf32>
    %c10_32 = arith.constant 10 : index
    %179 = memref.load %arg4[%c10_32] : memref<18xf32, #tpu.memory_space<smem>>
    %180 = vector.broadcast %179 : f32 to vector<2x4x16xf32>
    %181 = arith.mulf %180, %178 : vector<2x4x16xf32>
    %182 = arith.addf %177, %181 : vector<2x4x16xf32>
    %183 = vector.extract_strided_slice %172 {offsets = [0, 2, 0], sizes = [2, 4, 16], strides = [1, 1, 1]} : vector<2x6x18xf32> to vector<2x4x16xf32>
    %c11_33 = arith.constant 11 : index
    %184 = memref.load %arg4[%c11_33] : memref<18xf32, #tpu.memory_space<smem>>
    %185 = vector.broadcast %184 : f32 to vector<2x4x16xf32>
    %186 = arith.mulf %185, %183 : vector<2x4x16xf32>
    %187 = arith.addf %182, %186 : vector<2x4x16xf32>
    %188 = vector.extract_strided_slice %172 {offsets = [0, 0, 1], sizes = [2, 4, 16], strides = [1, 1, 1]} : vector<2x6x18xf32> to vector<2x4x16xf32>
    %c12_34 = arith.constant 12 : index
    %189 = memref.load %arg4[%c12_34] : memref<18xf32, #tpu.memory_space<smem>>
    %190 = vector.broadcast %189 : f32 to vector<2x4x16xf32>
    %191 = arith.mulf %190, %188 : vector<2x4x16xf32>
    %192 = arith.addf %187, %191 : vector<2x4x16xf32>
    %193 = vector.extract_strided_slice %172 {offsets = [0, 1, 1], sizes = [2, 4, 16], strides = [1, 1, 1]} : vector<2x6x18xf32> to vector<2x4x16xf32>
    %c13_35 = arith.constant 13 : index
    %194 = memref.load %arg4[%c13_35] : memref<18xf32, #tpu.memory_space<smem>>
    %195 = vector.broadcast %194 : f32 to vector<2x4x16xf32>
    %196 = arith.mulf %195, %193 : vector<2x4x16xf32>
    %197 = arith.addf %192, %196 : vector<2x4x16xf32>
    %198 = vector.extract_strided_slice %172 {offsets = [0, 2, 1], sizes = [2, 4, 16], strides = [1, 1, 1]} : vector<2x6x18xf32> to vector<2x4x16xf32>
    %c14_36 = arith.constant 14 : index
    %199 = memref.load %arg4[%c14_36] : memref<18xf32, #tpu.memory_space<smem>>
    %200 = vector.broadcast %199 : f32 to vector<2x4x16xf32>
    %201 = arith.mulf %200, %198 : vector<2x4x16xf32>
    %202 = arith.addf %197, %201 : vector<2x4x16xf32>
    %203 = vector.extract_strided_slice %172 {offsets = [0, 0, 2], sizes = [2, 4, 16], strides = [1, 1, 1]} : vector<2x6x18xf32> to vector<2x4x16xf32>
    %c15_37 = arith.constant 15 : index
    %204 = memref.load %arg4[%c15_37] : memref<18xf32, #tpu.memory_space<smem>>
    %205 = vector.broadcast %204 : f32 to vector<2x4x16xf32>
    %206 = arith.mulf %205, %203 : vector<2x4x16xf32>
    %207 = arith.addf %202, %206 : vector<2x4x16xf32>
    %208 = vector.extract_strided_slice %172 {offsets = [0, 1, 2], sizes = [2, 4, 16], strides = [1, 1, 1]} : vector<2x6x18xf32> to vector<2x4x16xf32>
    %c16_38 = arith.constant 16 : index
    %209 = memref.load %arg4[%c16_38] : memref<18xf32, #tpu.memory_space<smem>>
    %210 = vector.broadcast %209 : f32 to vector<2x4x16xf32>
    %211 = arith.mulf %210, %208 : vector<2x4x16xf32>
    %212 = arith.addf %207, %211 : vector<2x4x16xf32>
    %213 = vector.extract_strided_slice %172 {offsets = [0, 2, 2], sizes = [2, 4, 16], strides = [1, 1, 1]} : vector<2x6x18xf32> to vector<2x4x16xf32>
    %c17_39 = arith.constant 17 : index
    %214 = memref.load %arg4[%c17_39] : memref<18xf32, #tpu.memory_space<smem>>
    %215 = vector.broadcast %214 : f32 to vector<2x4x16xf32>
    %216 = arith.mulf %215, %213 : vector<2x4x16xf32>
    %217 = arith.addf %212, %216 : vector<2x4x16xf32>
    %218 = arith.negf %217 : vector<2x4x16xf32>
    %219 = math.exp %218 : vector<2x4x16xf32>
    %cst_40 = arith.constant 1.000000e+00 : f32
    %220 = vector.broadcast %cst_40 : f32 to vector<2x4x16xf32>
    %221 = arith.addf %220, %219 : vector<2x4x16xf32>
    %222 = arith.divf %220, %221 : vector<2x4x16xf32>
    %cst_41 = arith.constant dense<0.000000e+00> : vector<2x4xf32>
    %223 = vector.multi_reduction <add>, %115, %cst_41 [2] : vector<2x4x16xf32> to vector<2x4xf32>
    %224 = vector.shape_cast %223 : vector<2x4xf32> to vector<2x4x1xf32>
    %cst_42 = arith.constant 1.600000e+01 : f32
    %225 = vector.broadcast %cst_42 : f32 to vector<2x4x1xf32>
    %226 = arith.divf %224, %225 : vector<2x4x1xf32>
    %cst_43 = arith.constant 0.000000e+00 : f32
    %227 = vector.broadcast %cst_43 : f32 to vector<2x1x1xf32>
    %228 = tpu.concatenate %227, %226, %227 in 1 : vector<2x1x1xf32>, vector<2x4x1xf32>, vector<2x1x1xf32> -> vector<2x6x1xf32>
    %cst_44 = arith.constant 0.000000e+00 : f32
    %229 = vector.broadcast %cst_44 : f32 to vector<2x4x1xf32>
    %c0_45 = arith.constant 0 : index
    %230 = memref.load %arg6[%c0_45] : memref<3xf32, #tpu.memory_space<smem>>
    %231 = vector.extract_strided_slice %228 {offsets = [0, 0, 0], sizes = [2, 4, 1], strides = [1, 1, 1]} : vector<2x6x1xf32> to vector<2x4x1xf32>
    %232 = vector.broadcast %230 : f32 to vector<2x4x1xf32>
    %233 = arith.mulf %232, %231 : vector<2x4x1xf32>
    %234 = arith.addf %229, %233 : vector<2x4x1xf32>
    %c1_46 = arith.constant 1 : index
    %235 = memref.load %arg6[%c1_46] : memref<3xf32, #tpu.memory_space<smem>>
    %236 = vector.extract_strided_slice %228 {offsets = [0, 1, 0], sizes = [2, 4, 1], strides = [1, 1, 1]} : vector<2x6x1xf32> to vector<2x4x1xf32>
    %237 = vector.broadcast %235 : f32 to vector<2x4x1xf32>
    %238 = arith.mulf %237, %236 : vector<2x4x1xf32>
    %239 = arith.addf %234, %238 : vector<2x4x1xf32>
    %c2_47 = arith.constant 2 : index
    %240 = memref.load %arg6[%c2_47] : memref<3xf32, #tpu.memory_space<smem>>
    %241 = vector.extract_strided_slice %228 {offsets = [0, 2, 0], sizes = [2, 4, 1], strides = [1, 1, 1]} : vector<2x6x1xf32> to vector<2x4x1xf32>
    %242 = vector.broadcast %240 : f32 to vector<2x4x1xf32>
    %243 = arith.mulf %242, %241 : vector<2x4x1xf32>
    %244 = arith.addf %239, %243 : vector<2x4x1xf32>
    %245 = arith.negf %244 : vector<2x4x1xf32>
    %246 = math.exp %245 : vector<2x4x1xf32>
    %cst_48 = arith.constant 1.000000e+00 : f32
    %247 = vector.broadcast %cst_48 : f32 to vector<2x4x1xf32>
    %248 = arith.addf %247, %246 : vector<2x4x1xf32>
    %249 = arith.divf %247, %248 : vector<2x4x1xf32>
    %250 = vector.shape_cast %111 : vector<2x4x16xf32> to vector<2x4x1x16xf32>
    %251 = vector.shape_cast %222 : vector<2x4x16xf32> to vector<2x4x16x1xf32>
    %252 = vector.broadcast %250 : vector<2x4x1x16xf32> to vector<2x4x16x16xf32>
    %253 = vector.broadcast %251 : vector<2x4x16x1xf32> to vector<2x4x16x16xf32>
    %254 = arith.addf %252, %253 : vector<2x4x16x16xf32>
    %cst_49 = arith.constant 5.000000e-01 : f32
    %255 = vector.broadcast %cst_49 : f32 to vector<2x4x16x16xf32>
    %256 = arith.mulf %255, %254 : vector<2x4x16x16xf32>
    %257 = vector.shape_cast %249 : vector<2x4x1xf32> to vector<2x4x1x1xf32>
    %258 = vector.broadcast %257 : vector<2x4x1x1xf32> to vector<2x4x16x16xf32>
    %259 = arith.addf %256, %258 : vector<2x4x16x16xf32>
    %260 = arith.mulf %0, %259 : vector<2x4x16x16xf32>
    %c0_50 = arith.constant 0 : index
    %c0_51 = arith.constant 0 : index
    %c0_52 = arith.constant 0 : index
    %c0_53 = arith.constant 0 : index
    %261 = vector.load %arg7[%c0_50, %c0_51, %c0_52, %c0_53] : memref<2x4x16x16xf32, #tpu.memory_space<vmem>>, vector<2x4x16x16xf32>
    tpu.vector_store %arg7[%c0_50, %c0_51, %c0_52, %c0_53], %260 {strides = array<i32>} : memref<2x4x16x16xf32, #tpu.memory_space<vmem>>, vector<2x4x16x16xf32>,
    return
  }
  func.func @transform_0(%arg0: i32) -> (i32, i32, i32, i32) {
    %c0_i32 = arith.constant 0 : i32
    %c0_i32_0 = arith.constant 0 : i32
    %c0_i32_1 = arith.constant 0 : i32
    %c0_i32_2 = arith.constant 0 : i32
    return %arg0, %c0_i32, %c0_i32_0, %c0_i32_1 : i32, i32, i32, i32
  }
  func.func @transform_1(%arg0: i32) -> i32 {
    %c0_i32 = arith.constant 0 : i32
    %c0_i32_0 = arith.constant 0 : i32
    return %c0_i32 : i32
  }
  func.func @transform_2(%arg0: i32) -> i32 {
    %c0_i32 = arith.constant 0 : i32
    %c0_i32_0 = arith.constant 0 : i32
    return %c0_i32 : i32
  }
  func.func @transform_3(%arg0: i32) -> i32 {
    %c0_i32 = arith.constant 0 : i32
    %c0_i32_0 = arith.constant 0 : i32
    return %c0_i32 : i32
  }
  func.func @transform_4(%arg0: i32) -> i32 {
    %c0_i32 = arith.constant 0 : i32
    %c0_i32_0 = arith.constant 0 : i32
    return %c0_i32 : i32
  }
  func.func @transform_5(%arg0: i32) -> i32 {
    %c0_i32 = arith.constant 0 : i32
    %c0_i32_0 = arith.constant 0 : i32
    return %c0_i32 : i32
  }
  func.func @transform_6(%arg0: i32) -> (i32, i32, i32, i32) {
    %c0_i32 = arith.constant 0 : i32
    %c0_i32_0 = arith.constant 0 : i32
    %c0_i32_1 = arith.constant 0 : i32
    %c0_i32_2 = arith.constant 0 : i32
    return %arg0, %c0_i32, %c0_i32_0, %c0_i32_1 : i32, i32, i32, i32
  }
}

</mosaic_0001>

<bundles_post_ra>
// kernel: tpu_custom_call.1
= control target key start
LH: loop header
LB: loop body
LE: loop exit
PB: predicated region body
PF: predicated region fallthrough
CT: control target
= control target key end

     0   :  { %13 = vsyncpa [#allocation5], 0  ;;  %s2660_s0 = inlined_call_operand.hbm [shape: f32[2,4,16,16], index: 0, kind: input, shape index: {}]   ;;  %s2661_s1 = inlined_call_operand.vmem [shape: f32[18], index: 1, kind: input, shape index: {}]   ;;  %s2662_s2 = inlined_call_operand.<no memory space> [shape: f32[1], index: 2, kind: input, shape index: {}]   ;;  %s2663_s3 = inlined_call_operand.vmem [shape: f32[18], index: 3, kind: input, shape index: {}]   ;;  %s2664_s4 = inlined_call_operand.<no memory space> [shape: f32[1], index: 4, kind: input, shape index: {}]   ;;  %s2665_s5 = inlined_call_operand.vmem [shape: f32[3], index: 5, kind: input, shape index: {}]   ;;  %s2666_s6 = inlined_call_operand.hbm [shape: f32[2,4,16,16], index: 6, kind: output, shape index: {}]  }
   0x1   :  { %14 = vsyncpa [#allocation7], 0 }
   0x2   :  { %15 = vsyncpa [#allocation10], 0  ;;  %s47_s23 = sshll.u32 %s2663_s3, 4  ;;  %s48_s23 = int_to_ptr.vmem [resolvable:$true] %s47_s23 }
   0x3   :  { %16 = vsyncpa [#allocation6], 0  ;;  %s1774_s24 = scalar_lea.vmem %s48_s23, 16  ;;  %p1779_p1 = scmp.lt.s32.totalorder %s48_s23, %s48_s23 }
   0x4   :  { %p1775_p0 = scmp.ne.s32.totalorder %s48_s23, %s1774_s24  ;;  %p1780_p2 = scmp.lt.s32.totalorder %s1774_s24, %s1774_s24 }
   0x6   :  { %p1781_p3 = por %p1780_p2, %p1779_p1 }
   0x8   :  { %p1782_p4 = pnand %p1781_p3, %p1775_p0 }
   0xa   :  { %1785 = shalt.err (!%p1782_p4)
}
   0xb   :  { %s1858_s25 = smov [#allocation9]   ;;  %s1859_s26 = smov [#allocation4]  }
   0xc   :  { %50 = dma.vmem_to_smem %s48_s23, 16, %s1858_s25, [#allocation10]  }
   0xd   :  { %s22_s27 = sshll.u32 %s1859_s26, 4  ;;  %s23_s27 = int_to_ptr.vmem [resolvable:$true] %s22_s27 }
   0xe   :  { %s1794_s28 = scalar_lea.vmem %s23_s27, 2048  ;;  %p1799_p6 = scmp.lt.s32.totalorder %s23_s27, %s23_s27 }
   0xf   :  { %p1795_p5 = scmp.ne.s32.totalorder %s23_s27, %s1794_s28  ;;  %p1800_p7 = scmp.lt.s32.totalorder %s1794_s28, %s1794_s28 }
  0x11   :  { %p1801_p8 = por %p1800_p7, %p1799_p6 }
  0x13   :  { %p1802_p9 = pnand %p1801_p8, %p1795_p5 }
  0x15   :  { %1805 = shalt.err (!%p1802_p9)
}
  0x16   :  { %s1860_s3 = smov 128   ;;  %s1861_s29 = smov 8  }
  0x17   :  { %28 = dma.hbm_to_vmem [thread:$0]  %s2660_s0, 2048, %s23_s27, [#allocation5], %s1860_s3, %s1860_s3, %s1861_s29  }
  0x18   :  { %s35_s10 = sshll.u32 %s2661_s1, 4  ;;  %s59_s13 = sshll.u32 %s2665_s5, 4  ;;  %s36_s10 = int_to_ptr.vmem [resolvable:$true] %s35_s10  ;;  %s60_s13 = int_to_ptr.vmem [resolvable:$true] %s59_s13 }
  0x19   :  { %s1806_s14 = scalar_lea.vmem %s36_s10, 16  ;;  %p1811_p11 = scmp.lt.s32.totalorder %s36_s10, %s36_s10 }
  0x1a   :  { %p1807_p10 = scmp.ne.s32.totalorder %s36_s10, %s1806_s14  ;;  %p1812_p12 = scmp.lt.s32.totalorder %s1806_s14, %s1806_s14 }
  0x1c   :  { %p1813_p13 = por %p1812_p12, %p1811_p11 }
  0x1e   :  { %p1814_p0 = pnand %p1813_p13, %p1807_p10 }
  0x20   :  { %1817 = shalt.err (!%p1814_p0)
}
  0x21   :  { %s1862_s15 = smov [#allocation8]   ;;  %s1818_s0 = scalar_lea.vmem %s60_s13, 16 }
  0x22   :  { %38 = dma.vmem_to_smem %s36_s10, 16, %s1862_s15, [#allocation7]  }
  0x23   :  { %p1819_p1 = scmp.ne.s32.totalorder %s60_s13, %s1818_s0  ;;  %p1823_p2 = scmp.lt.s32.totalorder %s60_s13, %s60_s13 }
  0x24   :  { %p1824_p3 = scmp.lt.s32.totalorder %s1818_s0, %s1818_s0 }
  0x26   :  { %p1825_p4 = por %p1824_p3, %p1823_p2 }
  0x28   :  { %p1826_p5 = pnand %p1825_p4, %p1819_p1 }
  0x2a   :  { %1829 = shalt.err (!%p1826_p5)
}
  0x2b   :  { %s1863_s1 = smov [#allocation11]  }
  0x2c   :  { %62 = dma.vmem_to_smem %s60_s13, 16, %s1863_s1, [#allocation10]  }
  0x2d   :  { %1850 = dma.done.wait [#allocation5], 2048  }
  0x2e   :  { %1851 = vsyncadd [#allocation5], 4294965248 }
  0x2f   :  { %1852 = dma.done.wait [#allocation7], 16  }
  0x30   :  { %1853 = vsyncadd [#allocation7], 4294967280 }
  0x31   :  { %1854 = dma.done.wait [#allocation10], 32  }
  0x32   :  { %1855 = vsyncadd [#allocation10], 4294967264 }
  0x33   :  { %75 = sfence }
  0x34   :  { %v1920_v0 = vld [vmem:[#allocation4] sm:$0xff]  ;;  %v1922_v1 = vld [vmem:[#allocation4 + $0x8] sm:$0xff]  ;;  %v1924_v2 = vld [vmem:[#allocation4 + $0x10] sm:$0xff]  ;;  %vm92_vm0 = vcmask 130048   ;;  %vm257_vm1 = vcmask 1041409   ;;  %vm259_vm2 = vcmask 1042434  }
  0x35   :  { %v1926_v3 = vld [vmem:[#allocation4 + $0x18] sm:$0xff]  ;;  %v1928_v4 = vld [vmem:[#allocation4 + $0x20] sm:$0xff]  ;;  %v1930_v5 = vld [vmem:[#allocation4 + $0x28] sm:$0xff]  ;;  %v93_v6 = vsel %vm92_vm0, %v1920_v0, -inf  ;;  %v1936_v7 = vsel %vm92_vm0, %v1922_v1, -inf  ;;  %v1940_v8 = vsel %vm92_vm0, %v1924_v2, -inf }
  0x36   :  { %v1942_v9 = vld [vmem:[#allocation4 + $0x30] sm:$0xff]  ;;  %v1944_v10 = vld [vmem:[#allocation4 + $0x38] sm:$0xff]  ;;  %v95_v11 = vmax.f32 %v93_v6, %v1936_v7  ;;  %v103_v12 = vsel %vm92_vm0, %v1926_v3, -inf  ;;  %v1951_v13 = vsel %vm92_vm0, %v1928_v4, -inf  ;;  %v1955_v14 = vsel %vm92_vm0, %v1930_v5, -inf  ;;  %580 = vmax.xlane.f32.xlu1 %v93_v6  ;;  %v1968_v19 = vld [vmem:[#allocation4 + $0x40] sm:$0xff] }
  0x37   :  { %v104_v15 = vmax.f32 %v1940_v8, %v103_v12  ;;  %v113_v16 = vmax.f32 %v1951_v13, %v1955_v14  ;;  %v1962_v17 = vsel %vm92_vm0, %v1942_v9, -inf  ;;  %v1966_v18 = vsel %vm92_vm0, %v1944_v10, -inf  ;;  %v1970_v20 = vld [vmem:[#allocation4 + $0x48] sm:$0xff]  ;;  %v1972_v21 = vld [vmem:[#allocation4 + $0x50] sm:$0xff]  ;;  %v1976_v24 = vld [vmem:[#allocation4 + $0x58] sm:$0xff]  ;;  %s1864_s5 = smov 1  }
  0x38   :  { %v96_v22 = vrot.slane %v95_v11, 4  ;;  %v122_v23 = vmax.f32 %v1962_v17, %v1966_v18  ;;  %v1978_v25 = vld [vmem:[#allocation4 + $0x60] sm:$0xff]  ;;  %v1982_v26 = vsel %vm92_vm0, %v1968_v19, -inf  ;;  %v1984_v29 = vld [vmem:[#allocation4 + $0x68] sm:$0xff]  ;;  %v130_v30 = vsel %vm92_vm0, %v1970_v20, -inf  ;;  %v1995_v38 = vld [vmem:[#allocation4 + $0x70] sm:$0xff] }
  0x39   :  { %v105_v27 = vrot.slane %v104_v15, 4  ;;  %v114_v28 = vrot.slane %v113_v16, 4  ;;  %v1990_v31 = vsel %vm92_vm0, %v1972_v21, -inf  ;;  %v131_v34 = vmax.f32 %v1982_v26, %v130_v30  ;;  %v2006_v47 = vld [vmem:[#allocation4 + $0x78] sm:$0xff]  ;;  %s1678_s16 = sld [smem:[#allocation8 + $0x1]]  ;;  %s1865_s18 = smov 127  }
  0x3a   :  { %v97_v32 = vmax.f32 %v95_v11, %v96_v22  ;;  %v123_v33 = vrot.slane %v122_v23, 4  ;;  %v139_v35 = vsel %vm92_vm0, %v1976_v24, -inf  ;;  %586 = vmax.xlane.f32.xlu1 %v103_v12  ;;  %v2000_v40 = vsel %vm92_vm0, %v1978_v25, -inf  ;;  %s1679_s17 = sld [smem:[#allocation8 + $0x2]]  ;;  %s1866_s19 = smov 126  }
  0x3b   :  { %v106_v36 = vmax.f32 %v104_v15, %v105_v27  ;;  %v115_v37 = vmax.f32 %v113_v16, %v114_v28  ;;  %v140_v39 = vmax.f32 %v1990_v31, %v139_v35  ;;  %vm261_vm3 = vcmask 1043459   ;;  %s2154_s20 = sld [smem:[#allocation8]] }
  0x3c   :  { %v98_v41 = vrot.slane %v97_v32, 2  ;;  %v124_v42 = vmax.f32 %v122_v23, %v123_v33  ;;  %v132_v43 = vrot.slane %v131_v34, 4  ;;  %v2004_v44 = vsel %vm92_vm0, %v1984_v29, -inf  ;;  %s2314_s25 = sld [smem:[#allocation8 + $0x3]] }
  0x3d   :  { %v107_v45 = vrot.slane %v106_v36, 2  ;;  %v116_v46 = vrot.slane %v115_v37, 2  ;;  %v141_v48 = vrot.slane %v140_v39, 4  ;;  %v149_v49 = vmax.f32 %v2000_v40, %v2004_v44  ;;  %s2319_s26 = sld [smem:[#allocation9 + $0x3]] }
  0x3e   :  { %v99_v50 = vmax.f32 %v97_v32, %v98_v41  ;;  %v125_v51 = vrot.slane %v124_v42, 2  ;;  %v133_v52 = vmax.f32 %v131_v34, %v132_v43  ;;  %v2012_v53 = vsel %vm92_vm0, %v1995_v38, -inf  ;;  %598 = vmax.xlane.f32.xlu1 %v130_v30  ;;  %s2326_s27 = sld [smem:[#allocation9 + $0x6]] }
  0x3f   :  { %v108_v54 = vmax.f32 %v106_v36, %v107_v45  ;;  %v117_v55 = vmax.f32 %v115_v37, %v116_v46  ;;  %v142_v56 = vmax.f32 %v140_v39, %v141_v48  ;;  %v150_v57 = vrot.slane %v149_v49, 4  ;;  %s2328_s28 = sld [smem:[#allocation9 + $0x4]] }
  0x40   :  { %v100_v58 = vrot.slane %v99_v50, 1  ;;  %v126_v59 = vmax.f32 %v124_v42, %v125_v51  ;;  %v134_v60 = vrot.slane %v133_v52, 2  ;;  %v2016_v61 = vsel %vm92_vm0, %v2006_v47, -inf  ;;  %s2342_s30 = sld [smem:[#allocation9 + $0x5]] }
  0x41   :  { %v109_v62 = vrot.slane %v108_v54, 1  ;;  %v118_v63 = vrot.slane %v117_v55, 1  ;;  %v143_v6 = vrot.slane %v142_v56, 2  ;;  %v151_v11 = vmax.f32 %v149_v49, %v150_v57  ;;  %s2383_s7 = sld [smem:[#allocation9 + $0x7]] }
  0x42   :  { %v101_v12 = vmax.f32 %v99_v50, %v100_v58  ;;  %v127_v15 = vrot.slane %v126_v59, 1  ;;  %v135_v16 = vmax.f32 %v133_v52, %v134_v60  ;;  %v158_v22 = vmax.f32 %v2012_v53, %v2016_v61  ;;  %602 = vmax.xlane.f32.xlu1 %v139_v35  ;;  %s1704_s8 = sld [smem:[#allocation9 + $0x8]] }
  0x43   :  { %v110_v23 = vmax.f32 %v108_v54, %v109_v62  ;;  %v119_v27 = vmax.f32 %v117_v55, %v118_v63  ;;  %v144_v28 = vmax.f32 %v142_v56, %v143_v6  ;;  %v152_v30 = vrot.slane %v151_v11, 2  ;;  %s1708_s9 = sld [smem:[#allocation9 + $0xc]] }
  0x44   :  { %v128_v32 = vmax.f32 %v126_v59, %v127_v15  ;;  %v136_v33 = vrot.slane %v135_v16, 1  ;;  %v159_v34 = vrot.slane %v158_v22, 4  ;;  %v166_v36 = vsel %vm92_vm0, %v1922_v1, 0.0  ;;  %s1709_s10 = sld [smem:[#allocation9 + $0xd]] }
  0x45   :  { %v258_v37 = vsel %vm257_vm1, %v110_v23, %v101_v12  ;;  %v145_v39 = vrot.slane %v144_v28, 1  ;;  %v153_v41 = vmax.f32 %v151_v11, %v152_v30  ;;  %v2025_v42 = vsel %vm92_vm0, %v1920_v0, 0.0  ;;  %s1710_s11 = sld [smem:[#allocation9 + $0xe]] }
  0x46   :  { %v260_v35 = vsel %vm259_vm2, %v119_v27, %v258_v37  ;;  %v137_v43 = vmax.f32 %v135_v16, %v136_v33  ;;  %v160_v45 = vmax.f32 %v158_v22, %v159_v34  ;;  %614 = vadd.xlane.f32.xlu1 %v166_v36  ;;  %v167_v46 = vadd.f32 %v166_v36, %v2025_v42  ;;  %s1711_s12 = sld [smem:[#allocation9 + $0xf]] }
  0x47   :  { %v262_v48 = vsel %vm261_vm3, %v128_v32, %v260_v35  ;;  %v146_v49 = vmax.f32 %v144_v28, %v145_v39  ;;  %v154_v50 = vrot.slane %v153_v41, 1  ;;  %v175_v1 = vsel %vm92_vm0, %v1926_v3, 0.0  ;;  %s1712_s13 = sld [smem:[#allocation9 + $0x10]] }
  0x48   :  { %266 = vrot.lane.b32.xlu0 %v262_v48, %s1864_s5  ;;  %v161_v51 = vrot.slane %v160_v45, 2  ;;  %v168_v0 = vrot.slane %v167_v46, 4  ;;  %v2035_v52 = vsel %vm92_vm0, %v1924_v2, 0.0  ;;  %v202_v3 = vsel %vm92_vm0, %v1970_v20, 0.0  ;;  %s1713_s14 = sld [smem:[#allocation9 + $0x11]] }
  0x49   :  { %v155_v54 = vmax.f32 %v153_v41, %v154_v50  ;;  %v176_v55 = vadd.f32 %v175_v1, %v2035_v52  ;;  %v263_v57 = vsel %vm257_vm1, %v146_v49, %v137_v43  ;;  %v184_v12 = vsel %vm92_vm0, %v1930_v5, 0.0  ;;  %s1681_s15 = sld [smem:[#allocation8 + $0x4]] }
  0x4a   :  { %v162_v56 = vmax.f32 %v160_v45, %v161_v51  ;;  %v169_v58 = vadd.f32 %v168_v0, %v167_v46  ;;  %618 = vadd.xlane.f32.xlu1 %v175_v1  ;;  %v2046_v15 = vsel %vm92_vm0, %v1928_v4, 0.0  ;;  %v211_v22 = vsel %vm92_vm0, %v1976_v24, 0.0  ;;  %s1682_s0 = sld [smem:[#allocation8 + $0x5]] }
  0x4b   :  { %v177_v59 = vrot.slane %v176_v55, 4  ;;  %v264_v63 = vsel %vm259_vm2, %v155_v54, %v263_v57  ;;  %v185_v20 = vadd.f32 %v184_v12, %v2046_v15  ;;  %v193_v5 = vsel %vm92_vm0, %v1944_v10, 0.0  ;;  %s1684_s1 = sld [smem:[#allocation8 + $0x7]] }
  0x4c   :  { %v163_v60 = vrot.slane %v162_v56, 1  ;;  %v170_v62 = vrot.slane %v169_v58, 2  ;;  %v2057_v4 = vsel %vm92_vm0, %v1942_v9, 0.0  ;;  %v2063_v9 = vsel %vm92_vm0, %v1968_v19, 0.0  ;;  %s1690_s21 = sld [smem:[#allocation8 + $0xd]] }
  0x4d   :  { %v178_v6 = vadd.f32 %v177_v59, %v176_v55  ;;  %v186_v30 = vrot.slane %v185_v20, 4  ;;  %v194_v32 = vadd.f32 %v193_v5, %v2057_v4  ;;  %v2067_v46 = vsel %vm92_vm0, %v1972_v21, 0.0  ;;  %s1691_s22 = sld [smem:[#allocation8 + $0xe]] }
  0x4e   :  { %v164_v11 = vmax.f32 %v162_v56, %v163_v60  ;;  %v171_v2 = vadd.f32 %v170_v62, %v169_v58  ;;  %630 = vadd.xlane.f32.xlu1 %v202_v3  ;;  %v203_v49 = vadd.f32 %v202_v3, %v2063_v9  ;;  %v212_v50 = vadd.f32 %v211_v22, %v2067_v46  ;;  %s1693_s23 = sld [smem:[#allocation8 + $0x10]] }
  0x4f   :  { %v179_v16 = vrot.slane %v178_v6, 2  ;;  %v187_v34 = vadd.f32 %v186_v30, %v185_v20  ;;  %v195_v36 = vrot.slane %v194_v32, 4  ;;  %v220_v0 = vsel %vm92_vm0, %v1984_v29, 0.0  ;;  %s1694_s24 = sld [smem:[#allocation8 + $0x11]] }
  0x50   :  { %v265_v23 = vsel %vm261_vm3, %v164_v11, %v264_v63  ;;  %v172_v27 = vrot.slane %v171_v2, 1  ;;  %v219_v19 = vsel %vm92_vm0, %v1978_v25, 0.0  ;;  %v204_v56 = vrot.slane %v203_v49, 4 }
  0x51   :  { %268 = vrot.lane.b32.xlu0 %v265_v23, %s1864_s5  ;;  %v180_v28 = vadd.f32 %v179_v16, %v178_v6  ;;  %v188_v39 = vrot.slane %v187_v34, 2  ;;  %v196_v41 = vadd.f32 %v195_v36, %v194_v32  ;;  %v221_v55 = vadd.f32 %v220_v0, %v219_v19 }
  0x52   :  { %634 = vadd.xlane.f32.xlu1 %v211_v22  ;;  %v173_v24 = vadd.f32 %v172_v27, %v171_v2  ;;  %v213_v57 = vrot.slane %v212_v50, 4  ;;  %v228_v59 = vsel %vm92_vm0, %v1995_v38, 0.0  ;;  %v205_v63 = vadd.f32 %v204_v56, %v203_v49 }
  0x53   :  { %v181_v33 = vrot.slane %v180_v28, 1  ;;  %v189_v45 = vadd.f32 %v188_v39, %v187_v34  ;;  %v197_v10 = vrot.slane %v196_v41, 2  ;;  %v222_v62 = vrot.slane %v221_v55, 4 }
  0x54   :  { %v238_v35 = vmul.f32 0.0625, %v173_v24  ;;  %v214_v25 = vadd.f32 %v213_v57, %v212_v50  ;;  %vm272_vm4 = vcmask 7168   ;;  %vm275_vm5 = vcmask 138240  }
  0x55   :  { %v182_v37 = vadd.f32 %v181_v33, %v180_v28  ;;  %v190_v48 = vrot.slane %v189_v45, 1  ;;  %v223_v2 = vadd.f32 %v222_v62, %v221_v55  ;;  %vm284_vm6 = vcmask 1040384  }
  0x56   :  { %590 = vmax.xlane.f32.xlu1 %v1955_v14  ;;  %v198_v14 = vadd.f32 %v197_v10, %v196_v41  ;;  %v215_v16 = vrot.slane %v214_v25, 2  ;;  %vm287_vm7 = vcmask 1044480   ;;  %vm691_vm8 = vcmask 138312  }
  0x57   :  { %v239_v43 = vmul.f32 0.0625, %v182_v37  ;;  %v191_v1 = vadd.f32 %v190_v48, %v189_v45  ;;  %v224_v22 = vrot.slane %v223_v2, 2  ;;  %vm1153_vm9 = vcmask 130112  }
  0x58   :  { %v199_v54 = vrot.slane %v198_v14, 1  ;;  %v216_v20 = vadd.f32 %v215_v16, %v214_v25  ;;  %vm1226_vm10 = vcmask 125952  }
  0x59   :  { %v420_v51 = vsel %vm257_vm1, %v239_v43, %v238_v35  ;;  %v240_v21 = vmul.f32 0.0625, %v191_v1  ;;  %v225_v27 = vadd.f32 %v224_v22, %v223_v2  ;;  %v679_v2 = vlaneseq }
  0x5a   :  { %606 = vmax.xlane.f32.xlu1 %v2004_v44  ;;  %v200_v58 = vadd.f32 %v199_v54, %v198_v14  ;;  %v229_v44 = vsel %vm92_vm0, %v2006_v47, 0.0  ;;  %v217_v30 = vrot.slane %v216_v20, 1 }
  0x5b   :  { %v421_v3 = vsel %vm259_vm2, %v240_v21, %v420_v51  ;;  %v230_v60 = vadd.f32 %v229_v44, %v228_v59  ;;  %v226_v24 = vrot.slane %v225_v27, 1  ;;  %v680_v16 = vand.u32 127, %v679_v2 }
  0x5c   :  { %v241_v29 = vmul.f32 0.0625, %v200_v58  ;;  %v218_v34 = vadd.f32 %v217_v30, %v216_v20  ;;  %v2160_v20 = vshrl.u32 %v679_v2, 7 }
  0x5d   :  { %v231_v11 = vrot.slane %v230_v60, 4  ;;  %v227_v36 = vadd.f32 %v226_v24, %v225_v27  ;;  %v686_v30 = vadd.s32 4294967287, %v680_v16 }
  0x5e   :  { %622 = vadd.xlane.f32.xlu1 %v184_v12  ;;  %v2083_v6 = vsel %vm261_vm3, %v241_v29, %v421_v3  ;;  %v206_v12 = vrot.slane %v205_v63, 2  ;;  %v243_v39 = vmul.f32 0.0625, %v218_v34 }
  0x5f   :  { %v232_v47 = vadd.f32 %v231_v11, %v230_v60  ;;  %v244_v41 = vmul.f32 0.0625, %v227_v36 }
  0x60   :  { %v207_v38 = vadd.f32 %v206_v12, %v205_v63 }
  0x61   :  { %v233_v23 = vrot.slane %v232_v47, 2 }
  0x62   :  { %638 = vadd.xlane.f32.xlu1 %v220_v0  ;;  %v208_v28 = vrot.slane %v207_v38, 1 }
  0x63   :  { %v234_v32 = vadd.f32 %v233_v23, %v232_v47  ;;  %v1148_v23 = vadd.s32 4294967288, %v680_v16 }
  0x64   :  { %v209_v33 = vadd.f32 %v208_v28, %v207_v38  ;;  %v681_v38 = vadd.s32 4294967295, %v680_v16  ;;  %v291_v28 = vstv %s2154_s20  ;;  %s2574_s20 = sld [smem:[#allocation8 + $0xc]] }
  0x65   :  { %v2170_v34 = vsub.s32 %v1148_v23, %v2160_v20 }
  0x66   :  { %594 = vmax.xlane.f32.xlu1 %v1966_v18  ;;  %v235_v18 = vrot.slane %v234_v32, 1  ;;  %v242_v37 = vmul.f32 0.0625, %v209_v33  ;;  %v2164_v24 = vsub.s32 %v681_v38, %v2160_v20 }
  0x68   :  { %v423_v35 = vsel %vm257_vm1, %v243_v39, %v242_v37  ;;  %v247_v37 = vstv %s2662_s2  ;;  %v2178_v39 = vsub.s32 %v686_v30, %v2160_v20  ;;  %s2572_s2 = sld [smem:[#allocation8 + $0x9]] }
  0x6a   :  { %610 = vmax.xlane.f32.xlu1 %v2016_v61  ;;  %v236_v61 = vadd.f32 %v235_v18, %v234_v32 }
  0x6e   :  { %626 = vadd.xlane.f32.xlu1 %v193_v5  ;;  %v424_v5 = vsel %vm259_vm2, %v244_v41, %v423_v35  ;;  %v2185_v35 = vsub.s32 %v680_v16, %v2160_v20 }
  0x70   :  { %582 = vmax.xlane.f32.xlu0 %v1936_v7  ;;  %v245_v7 = vmul.f32 0.0625, %v236_v61 }
  0x72   :  { %642 = vadd.xlane.f32.xlu1 %v229_v44  ;;  %v425_v43 = vsel %vm261_vm3, %v245_v7, %v424_v5 }
  0x74   :  { %584 = vmax.xlane.f32.xlu0 %v1940_v8 }
  0x78   :  { %596 = vmax.xlane.f32.xlu0 %v1982_v26 }
  0x7c   :  { %600 = vmax.xlane.f32.xlu0 %v1990_v31 }
  0x80   :  { %612 = vadd.xlane.f32.xlu0 %v2025_v42  ;;  %v311_v42 = vstv %s1679_s17  ;;  %s2482_s17 = sld [smem:[#allocation8 + $0xb]] }
  0x83   :  { %428 = vrot.lane.b32.xlu1 %v425_v43, %s1864_s5 }
  0x84   :  { %616 = vadd.xlane.f32.xlu0 %v2035_v52 }
  0x88   :  { %628 = vadd.xlane.f32.xlu0 %v2063_v9 }
  0x8c   :  { %632 = vadd.xlane.f32.xlu0 %v2067_v46 }
  0x90   :  { %588 = vmax.xlane.f32.xlu0 %v1951_v13 }
  0x94   :  { %604 = vmax.xlane.f32.xlu0 %v2000_v40  ;;  %v297_v40 = vstv %s1678_s16  ;;  %s2475_s16 = sld [smem:[#allocation8 + $0xa]] }
  0x98   :  { %620 = vadd.xlane.f32.xlu0 %v2046_v15 }
  0x9c   :  { %636 = vadd.xlane.f32.xlu0 %v219_v19 }
  0xa0   :  { %592 = vmax.xlane.f32.xlu0 %v1962_v17 }
  0xa4   :  { %608 = vmax.xlane.f32.xlu0 %v2012_v53 }
  0xa8   :  { %624 = vadd.xlane.f32.xlu0 %v2057_v4 }
  0xac   :  { %640 = vadd.xlane.f32.xlu0 %v228_v59 }
  0xba   :  { %v267_v8 = vpop.permute.xlu0 %266 }
  0xbb   :  { %v273_v26 = vsel %vm272_vm4, 0.0, %v267_v8 }
  0xbc   :  { %v276_v13 = vsel %vm275_vm5, %v273_v26, 0.0 }
  0xbd   :  { %v280_v31 = vrot.slane %v276_v13, 7 }
  0xbf   :  { %v285_v17 = vsel %vm284_vm6, 0.0, %v280_v31  ;;  %v2128_v14 = vpop.xlane.xlu1 %580 }
  0xc0   :  { %v2109_v53 = vsel %vm287_vm7, %v285_v17, 0.0  ;;  %v685_v5 = vrot.slane %v2128_v14, %v2164_v24 }
  0xc1   :  { %v298_v52 = vmul.f32 %v297_v40, %v2109_v53  ;;  %v312_v15 = vmul.f32 %v311_v42, %v2109_v53  ;;  %v292_v33 = vmul.f32 %v291_v28, %v2109_v53 }
  0xc2   :  { %426 = vrot.lane.b32.xlu0 %v2083_v6, %s1864_s5  ;;  %s2458_s5 = sld [smem:[#allocation8 + $0x8]] }
  0xc3   :  { %v269_v4 = vpop.permute.xlu0 %268  ;;  %302 = vrot.lane.b32.xlu1 %v298_v52, %s1865_s18  ;;  %v2130_v1 = vpop.xlane.xlu1 %586  ;;  %v2199_v26 = vadd.f32 %v292_v33, %v247_v37 }
  0xc4   :  { %v274_v45 = vsel %vm272_vm4, 0.0, %v269_v4  ;;  %v700_v43 = vrot.slane %v2130_v1, %v2178_v39 }
  0xc5   :  { %v277_v10 = vsel %vm275_vm5, %v274_v45, 0.0 }
  0xc6   :  { %v281_v9 = vrot.slane %v277_v10, 7  ;;  %316 = vrot.lane.b32.xlu0 %v312_v15, %s1866_s19 }
  0xc7   :  { %v2132_v51 = vpop.xlane.xlu1 %598 }
  0xc8   :  { %v286_v46 = vsel %vm284_vm6, 0.0, %v281_v9  ;;  %v727_v8 = vrot.slane %v2132_v51, %v2178_v39 }
  0xc9   :  { %v2121_v48 = vsel %vm287_vm7, %v286_v46, 0.0 }
  0xca   :  { %v299_v49 = vmul.f32 %v297_v40, %v2121_v48  ;;  %v2125_v50 = vmul.f32 %v311_v42, %v2121_v48 }
  0xcb   :  { %v2134_v0 = vpop.xlane.xlu1 %602 }
  0xcc   :  { %304 = vrot.lane.b32.xlu1 %v299_v49, %s1865_s18  ;;  %v736_v13 = vrot.slane %v2134_v0, %v2178_v39 }
  0xcf   :  { %v615_v19 = vpop.xlane.xlu1 %614 }
  0xd0   :  { %v2172_v18 = vmul.f32 0.0625, %v615_v19 }
  0xd2   :  { %v1152_v31 = vrot.slane %v2172_v18, %v2170_v34 }
  0xd3   :  { %v619_v54 = vpop.xlane.xlu1 %618 }
  0xd4   :  { %v2180_v61 = vmul.f32 0.0625, %v619_v54 }
  0xd6   :  { %v1162_v15 = vrot.slane %v2180_v61, %v2170_v34 }
  0xd7   :  { %v631_v21 = vpop.xlane.xlu1 %630 }
  0xd8   :  { %v2182_v41 = vmul.f32 0.0625, %v631_v21 }
  0xda   :  { %v1189_v45 = vrot.slane %v2182_v41, %v2170_v34 }
  0xdb   :  { %v635_v56 = vpop.xlane.xlu1 %634 }
  0xdc   :  { %v2187_v7 = vmul.f32 0.0625, %v635_v56 }
  0xde   :  { %v1198_v46 = vrot.slane %v2187_v7, %v2170_v34 }
  0xdf   :  { %v2140_v58 = vpop.xlane.xlu1 %590 }
  0xe0   :  { %v709_v49 = vrot.slane %v2140_v58, %v2178_v39 }
  0xe3   :  { %v2146_v3 = vpop.xlane.xlu1 %606 }
  0xe4   :  { %v745_v0 = vrot.slane %v2146_v3, %v2178_v39 }
  0xe7   :  { %v623_v29 = vpop.xlane.xlu1 %622 }
  0xe8   :  { %v2205_v40 = vmul.f32 0.0625, %v623_v29 }
  0xea   :  { %v1171_v56 = vrot.slane %v2205_v40, %v2170_v34 }
  0xeb   :  { %v639_v25 = vpop.xlane.xlu1 %638 }
  0xec   :  { %v2207_v17 = vmul.f32 0.0625, %v639_v25 }
  0xef   :  { %v2150_v11 = vpop.xlane.xlu1 %594 }
  0xf0   :  { %v718_v3 = vrot.slane %v2150_v11, %v2178_v39 }
  0xf3   :  { %v2158_v22 = vpop.xlane.xlu1 %610 }
  0xf7   :  { %v627_v32 = vpop.xlane.xlu1 %626 }
  0xf8   :  { %v2215_v10 = vmul.f32 0.0625, %v627_v32 }
  0xf9   :  { %v2136_v55 = vpop.xlane.xlu0 %582 }
  0xfa   :  { %v690_v1 = vrot.slane %v2136_v55, %v2178_v39 }
  0xfb   :  { %v643_v52 = vpop.xlane.xlu1 %642 }
  0xfc   :  { %v2231_v19 = vmul.f32 0.0625, %v643_v52  ;;  %v692_v11 = vsel %vm691_vm8, %v690_v1, %v685_v5 }
  0xfd   :  { %v2138_v57 = vpop.xlane.xlu0 %584 }
  0xfe   :  { %v696_v9 = vrot.slane %v2138_v57, %v2164_v24  ;;  %v1207_v57 = vrot.slane %v2207_v17, %v2170_v34  ;;  %v1216_v38 = vrot.slane %v2231_v19, %v2170_v34 }
  0xff   :  { %v2256_v2 = vpop.permute.xlu1 %428 }
 0x100   :  { %v701_v29 = vsel %vm691_vm8, %v700_v43, %v696_v9 }
 0x101   :  { %v2142_v44 = vpop.xlane.xlu0 %596  ;;  %v756_v33 = vsel %vm257_vm1, %v701_v29, %v692_v11 }
 0x105   :  { %v2144_v59 = vpop.xlane.xlu0 %600 }
 0x106   :  { %v732_v54 = vrot.slane %v2144_v59, %v2164_v24  ;;  %v1180_v59 = vrot.slane %v2215_v10, %v2170_v34 }
 0x109   :  { %v613_v60 = vpop.xlane.xlu0 %612 }
 0x10a   :  { %v2227_v51 = vmul.f32 0.0625, %v613_v60  ;;  %v754_v60 = vrot.slane %v2158_v22, %v2178_v39 }
 0x10c   :  { %v1147_v16 = vrot.slane %v2227_v51, %v2185_v35 }
 0x10d   :  { %v617_v62 = vpop.xlane.xlu0 %616 }
 0x10e   :  { %v2211_v4 = vmul.f32 0.0625, %v617_v62  ;;  %v723_v62 = vrot.slane %v2142_v44, %v2164_v24  ;;  %v737_v44 = vsel %vm691_vm8, %v736_v13, %v732_v54  ;;  %v1154_v52 = vsel %vm1153_vm9, %v1152_v31, %v1147_v16 }
 0x110   :  { %v1158_v55 = vrot.slane %v2211_v4, %v2185_v35  ;;  %v728_v34 = vsel %vm691_vm8, %v727_v8, %v723_v62 }
 0x111   :  { %v2148_v63 = vpop.xlane.xlu0 %628 }
 0x112   :  { %v2262_v22 = vmul.f32 0.0625, %v2148_v63  ;;  %v1163_v63 = vsel %vm1153_vm9, %v1162_v15, %v1158_v55 }
 0x114   :  { %v1185_v15 = vrot.slane %v2262_v22, %v2185_v35 }
 0x115   :  { %v633_v6 = vpop.xlane.xlu0 %632 }
 0x116   :  { %v2235_v21 = vmul.f32 0.0625, %v633_v6  ;;  %v1190_v11 = vsel %vm1153_vm9, %v1189_v45, %v1185_v15  ;;  %v932_v15 = vrot.slane %v2180_v61, %v2178_v39  ;;  %v950_v61 = vrot.slane %v2215_v10, %v2178_v39 }
 0x118   :  { %v1194_v23 = vrot.slane %v2235_v21, %v2185_v35 }
 0x119   :  { %v2152_v12 = vpop.xlane.xlu0 %588 }
 0x11a   :  { %v1199_v9 = vsel %vm1153_vm9, %v1198_v46, %v1194_v23 }
 0x11d   :  { %v2156_v47 = vpop.xlane.xlu0 %604 }
 0x11e   :  { %v741_v30 = vrot.slane %v2156_v47, %v2164_v24  ;;  %v759_v47 = vsel %vm257_vm1, %v737_v44, %v728_v34 }
 0x120   :  { %v746_v1 = vsel %vm691_vm8, %v745_v0, %v741_v30 }
 0x121   :  { %v621_v27 = vpop.xlane.xlu0 %620 }
 0x122   :  { %v2223_v14 = vmul.f32 0.0625, %v621_v27  ;;  %v705_v27 = vrot.slane %v2152_v12, %v2164_v24 }
 0x124   :  { %v1167_v25 = vrot.slane %v2223_v14, %v2185_v35  ;;  %v710_v8 = vsel %vm691_vm8, %v709_v49, %v705_v27 }
 0x125   :  { %v637_v36 = vpop.xlane.xlu0 %636  ;;  %v757_v16 = vsel %vm259_vm2, %v710_v8, %v756_v33 }
 0x126   :  { %v2254_v6 = vmul.f32 0.0625, %v637_v36  ;;  %v1172_v12 = vsel %vm1153_vm9, %v1171_v56, %v1167_v25 }
 0x128   :  { %v1203_v43 = vrot.slane %v2254_v6, %v2185_v35 }
 0x129   :  { %v593_v42 = vpop.xlane.xlu0 %592 }
 0x12a   :  { %v714_v36 = vrot.slane %v593_v42, %v2164_v24  ;;  %v1208_v0 = vsel %vm1153_vm9, %v1207_v57, %v1203_v43  ;;  %v325_v43 = vstv %s2314_s25  ;;  %s2580_s25 = sld [smem:[#allocation8 + $0xf]] }
 0x12c   :  { %v719_v55 = vsel %vm691_vm8, %v718_v3, %v714_v36 }
 0x12d   :  { %v609_v58 = vpop.xlane.xlu0 %608  ;;  %v758_v23 = vsel %vm261_vm3, %v719_v55, %v757_v16  ;;  %v986_v55 = vrot.slane %v2231_v19, %v2178_v39 }
 0x12e   :  { %v750_v13 = vrot.slane %v609_v58, %v2164_v24  ;;  %v1218_v58 = vsel %vm257_vm1, %v1163_v63, %v1154_v52  ;;  %v923_v52 = vrot.slane %v2172_v18, %v2178_v39  ;;  %v977_v18 = vrot.slane %v2207_v17, %v2178_v39 }
 0x12f   :  { %v1219_v62 = vsel %vm259_vm2, %v1172_v12, %v1218_v58  ;;  %v809_v12 = vstv %s2319_s26  ;;  %v964_v58 = vrot.slane %v2235_v21, %v2164_v24  ;;  %v959_v21 = vrot.slane %v2182_v41, %v2178_v39  ;;  %s778_s26 = sld [smem:[#allocation9]] }
 0x130   :  { %v755_v25 = vsel %vm691_vm8, %v754_v60, %v750_v13  ;;  %v1221_v60 = vsel %vm257_vm1, %v1199_v9, %v1190_v11 }
 0x131   :  { %v625_v32 = vpop.xlane.xlu0 %624  ;;  %v1222_v45 = vsel %vm259_vm2, %v1208_v0, %v1221_v60 }
 0x132   :  { %v2276_v5 = vmul.f32 0.0625, %v625_v32 }
 0x134   :  { %v1176_v42 = vrot.slane %v2276_v5, %v2185_v35  ;;  %v946_v10 = vrot.slane %v2276_v5, %v2164_v24 }
 0x135   :  { %v641_v54 = vpop.xlane.xlu0 %640  ;;  %v303_v56 = vpop.permute.xlu1 %302 }
 0x136   :  { %v2294_v29 = vmul.f32 0.0625, %v641_v54  ;;  %v1181_v31 = vsel %vm1153_vm9, %v1180_v59, %v1176_v42  ;;  %v308_v49 = vadd.f32 %v303_v56, %v2199_v26  ;;  %v760_v59 = vsel %vm259_vm2, %v746_v1, %v759_v47 }
 0x137   :  { %v1220_v46 = vsel %vm261_vm3, %v1181_v31, %v1219_v62  ;;  %v761_v26 = vsel %vm261_vm3, %v755_v25, %v760_v59  ;;  %v326_v47 = vmul.f32 %v325_v43, %v2109_v53  ;;  %v968_v42 = vrot.slane %v2187_v7, %v2178_v39 }
 0x138   :  { %v1212_v3 = vrot.slane %v2294_v29, %v2185_v35  ;;  %v1227_v44 = vsel %vm1226_vm10, %v1220_v46, 0.0  ;;  %v764_v35 = vsel %vm272_vm4, 0.0, %v758_v23  ;;  %v765_v32 = vsel %vm272_vm4, 0.0, %v761_v26 }
 0x139   :  { %1228 = vadd.xlane.f32.xlu0 %v1227_v44  ;;  %v767_v33 = vsel %vm275_vm5, %v765_v32, 0.0  ;;  %v2323_v63 = vpop.permute.xlu0 %426  ;;  %v928_v1 = vrot.slane %v2211_v4, %v2164_v24  ;;  %v941_v54 = vrot.slane %v2205_v40, %v2178_v39  ;;  %v919_v7 = vrot.slane %v2227_v51, %v2164_v24 }
 0x13a   :  { %v1217_v57 = vsel %vm1153_vm9, %v1216_v38, %v1212_v3  ;;  %v766_v38 = vsel %vm275_vm5, %v764_v35, 0.0  ;;  %v771_v34 = vrot.slane %v767_v33, 7  ;;  %v937_v56 = vrot.slane %v2223_v14, %v2164_v24 }
 0x13b   :  { %v1223_v27 = vsel %vm261_vm3, %v1217_v57, %v1222_v45  ;;  %v770_v36 = vrot.slane %v766_v38, 7  ;;  %v973_v40 = vrot.slane %v2254_v6, %v2164_v24  ;;  %v955_v14 = vrot.slane %v2262_v22, %v2164_v24 }
 0x13c   :  { %v1230_v30 = vsel %vm1226_vm10, %v1223_v27, 0.0  ;;  %v775_v9 = vsel %vm284_vm6, 0.0, %v771_v34  ;;  %v982_v31 = vrot.slane %v2294_v29, %v2164_v24  ;;  %v933_v6 = vsel %vm691_vm8, %v932_v15, %v928_v1 }
 0x13d   :  { %1231 = vadd.xlane.f32.xlu1 %v1230_v30  ;;  %v774_v13 = vsel %vm284_vm6, 0.0, %v770_v36  ;;  %v317_v8 = vpop.permute.xlu0 %316  ;;  %v2364_v17 = vsel %vm287_vm7, %v775_v9, 0.0  ;;  %v855_v25 = vstv %s2326_s27  ;;  %v330_v5 = vrot.slane %v326_v47, 1  ;;  %s1697_s27 = sld [smem:[#allocation9 + $0x1]] }
 0x13e   :  { %v2359_v4 = vsel %vm287_vm7, %v774_v13, 0.0  ;;  %v322_v51 = vadd.f32 %v317_v8, %v308_v49  ;;  %v969_v46 = vsel %vm691_vm8, %v968_v42, %v964_v58  ;;  %v942_v41 = vsel %vm691_vm8, %v941_v54, %v937_v56 }
 0x13f   :  { %v810_v62 = vmul.f32 %v809_v12, %v2359_v4  ;;  %v811_v49 = vmul.f32 %v809_v12, %v2364_v17  ;;  %v823_v22 = vstv %s2328_s28  ;;  %v924_v39 = vsel %vm691_vm8, %v923_v52, %v919_v7  ;;  %s1698_s28 = sld [smem:[#allocation9 + $0x2]] }
 0x140   :  { %v978_v24 = vsel %vm691_vm8, %v977_v18, %v973_v40  ;;  %v951_v19 = vsel %vm691_vm8, %v950_v61, %v946_v10  ;;  %v2389_v29 = vadd.f32 %v330_v5, %v322_v51  ;;  %v988_v0 = vsel %vm257_vm1, %v933_v6, %v924_v39 }
 0x141   :  { %v960_v11 = vsel %vm691_vm8, %v959_v21, %v955_v14  ;;  %v987_v16 = vsel %vm691_vm8, %v986_v55, %v982_v31  ;;  %v839_v3 = vstv %s2342_s30  ;;  %v989_v59 = vsel %vm259_vm2, %v942_v41, %v988_v0 }
 0x142   :  { %v991_v44 = vsel %vm257_vm1, %v969_v46, %v960_v11  ;;  %v856_v23 = vmul.f32 %v855_v25, %v2359_v4  ;;  %v824_v60 = vmul.f32 %v823_v22, %v2359_v4  ;;  %v990_v57 = vsel %vm261_vm3, %v951_v19, %v989_v59 }
 0x143   :  { %v992_v26 = vsel %vm259_vm2, %v978_v24, %v991_v44  ;;  %v857_v45 = vmul.f32 %v855_v25, %v2364_v17  ;;  %v825_v27 = vmul.f32 %v823_v22, %v2364_v17  ;;  %v996_v30 = vsel %vm272_vm4, 0.0, %v990_v57 }
 0x144   :  { %v993_v35 = vsel %vm261_vm3, %v987_v16, %v992_v26  ;;  %v828_v32 = vrot.slane %v824_v60, 1  ;;  %v840_v38 = vmul.f32 %v839_v3, %v2359_v4  ;;  %v841_v34 = vmul.f32 %v839_v3, %v2364_v17 }
 0x145   :  { %v997_v33 = vsel %vm272_vm4, 0.0, %v993_v35  ;;  %v829_v36 = vrot.slane %v825_v27, 1  ;;  %v869_v13 = vstv %s2383_s7  ;;  %v998_v12 = vsel %vm275_vm5, %v996_v30, 0.0  ;;  %s1707_s7 = sld [smem:[#allocation9 + $0xb]] }
 0x146   :  { %v999_v47 = vsel %vm275_vm5, %v997_v33, 0.0  ;;  %v844_v52 = vrot.slane %v840_v38, 2  ;;  %v870_v15 = vmul.f32 %v869_v13, %v2359_v4  ;;  %v845_v42 = vrot.slane %v841_v34, 2 }
 0x147   :  { %v871_v9 = vmul.f32 %v869_v13, %v2364_v17  ;;  %v885_v8 = vstv %s1704_s8  ;;  %v1002_v1 = vrot.slane %v998_v12, 7  ;;  %v1003_v54 = vrot.slane %v999_v47, 7  ;;  %s2546_s8 = sld [smem:[#allocation8 + $0x6]] }
 0x148   :  { %v874_v18 = vrot.slane %v870_v15, 1  ;;  %v886_v61 = vmul.f32 %v885_v8, %v2359_v4  ;;  %v887_v58 = vmul.f32 %v885_v8, %v2364_v17  ;;  %v1041_v14 = vstv %s1708_s9  ;;  %s1716_s9 = sld [smem:[#allocation11 + $0x1]] }
 0x149   :  { %v875_v7 = vrot.slane %v871_v9, 1  ;;  %v1006_v56 = vsel %vm284_vm6, 0.0, %v1002_v1  ;;  %v1007_v40 = vsel %vm284_vm6, 0.0, %v1003_v54  ;;  %v1055_v55 = vstv %s1709_s10  ;;  %s2548_s10 = sld [smem:[#allocation11]] }
 0x14a   :  { %v890_v10 = vrot.slane %v886_v61, 2  ;;  %v2427_v51 = vsel %vm287_vm7, %v1006_v56, 0.0  ;;  %v891_v21 = vrot.slane %v887_v58, 2  ;;  %v2430_v31 = vsel %vm287_vm7, %v1007_v40, 0.0 }
 0x14b   :  { %v1042_v6 = vmul.f32 %v1041_v14, %v2427_v51  ;;  %v1043_v25 = vmul.f32 %v1041_v14, %v2430_v31  ;;  %v1057_v5 = vmul.f32 %v1055_v55, %v2430_v31  ;;  %v1071_v46 = vstv %s1710_s11  ;;  %s2551_s11 = sld [smem:[#allocation11 + $0x2]] }
 0x14c   :  { %v1073_v39 = vmul.f32 %v1071_v46, %v2430_v31  ;;  %v1087_v0 = vstv %s1711_s12  ;;  %v1101_v11 = vstv %s1712_s13  ;;  %v337_v27 = vstv %s1681_s15 }
 0x14d   :  { %v1061_v22 = vrot.slane %v1057_v5, 1  ;;  %v1088_v16 = vmul.f32 %v1087_v0, %v2427_v51  ;;  %v1102_v3 = vmul.f32 %v1101_v11, %v2427_v51  ;;  %v1089_v44 = vmul.f32 %v1087_v0, %v2430_v31 }
 0x14e   :  { %814 = vrot.lane.b32.xlu1 %v810_v62, %s1865_s18  ;;  %v1056_v62 = vmul.f32 %v1055_v55, %v2427_v51  ;;  %v1077_v19 = vrot.slane %v1073_v39, 2  ;;  %v1103_v59 = vmul.f32 %v1101_v11, %v2430_v31  ;;  %v353_v38 = vstv %s1682_s0 }
 0x14f   :  { %816 = vrot.lane.b32.xlu0 %v811_v49, %s1865_s18  ;;  %v1072_v49 = vmul.f32 %v1071_v46, %v2427_v51  ;;  %v1106_v60 = vrot.slane %v1102_v3, 1  ;;  %v432_v33 = vsel %vm272_vm4, 0.0, %v2323_v63  ;;  %v354_v13 = vmul.f32 %v353_v38, %v2109_v53 }
 0x150   :  { %v1060_v41 = vrot.slane %v1056_v62, 1  ;;  %v1107_v57 = vrot.slane %v1103_v59, 1  ;;  %v434_v12 = vsel %vm275_vm5, %v432_v33, 0.0  ;;  %v381_v47 = vstv %s1684_s1 }
 0x151   :  { %v1076_v24 = vrot.slane %v1072_v49, 2  ;;  %v355_v15 = vmul.f32 %v353_v38, %v2121_v48  ;;  %v358_v9 = vrot.slane %v354_v13, 1  ;;  %v382_v8 = vmul.f32 %v381_v47, %v2109_v53 }
 0x152   :  { %860 = vrot.lane.b32.xlu1 %v856_v23, %s1866_s19  ;;  %v1117_v23 = vstv %s1713_s14  ;;  %v397_v1 = vstv %s2458_s5  ;;  %v453_v55 = vstv %s2475_s16  ;;  %v1867_v33 = vmov 0   ;;  %s1869_s14 = smov [#allocation12]  }
 0x153   :  { %862 = vrot.lane.b32.xlu0 %v857_v45, %s1866_s19  ;;  %v1118_v26 = vmul.f32 %v1117_v23, %v2427_v51  ;;  %v1119_v45 = vmul.f32 %v1117_v23, %v2430_v31  ;;  %v359_v54 = vrot.slane %v355_v15, 1  ;;  %v386_v61 = vrot.slane %v382_v8, 2  ;;  %1733 = vset.pattern.permute.xlu1 %v1867_v33  ;;  %s1664_s15 = sshll.u32 %s1869_s14, 4  ;;  %s1665_s15 = int_to_ptr.vmem [resolvable:$true] %s1664_s15 }
 0x154   :  { %v467_v5 = vstv %s2482_s17  ;;  %v493_v46 = vstv %s1690_s21  ;;  %v509_v39 = vstv %s1691_s22  ;;  %1732 = vset.pattern.permute.xlu0 %v1867_v33  ;;  %s1830_s0 = scalar_lea.vmem %s1665_s15, 2048  ;;  %p1835_p7 = scmp.lt.s32.totalorder %s1665_s15, %s1665_s15 }
 0x155   :  { %v1122_v35 = vrot.slane %v1118_v26, 2  ;;  %v1123_v30 = vrot.slane %v1119_v45, 2  ;;  %p1831_p6 = scmp.ne.s32.totalorder %s1665_s15, %s1830_s0  ;;  %p1836_p8 = scmp.lt.s32.totalorder %s1830_s0, %s1830_s0 }
 0x156   :  { %830 = vrot.lane.b32.xlu1 %v828_v32, %s1865_s18  ;;  %v338_v32 = vmul.f32 %v337_v27, %v2109_v53 }
 0x157   :  { %832 = vrot.lane.b32.xlu0 %v829_v36, %s1865_s18  ;;  %v339_v36 = vmul.f32 %v337_v27, %v2121_v48  ;;  %p1837_p9 = por %p1836_p8, %p1835_p7 }
 0x158   :  { %v342_v34 = vrot.slane %v338_v32, 1 }
 0x159   :  { %v343_v63 = vrot.slane %v339_v36, 1  ;;  %v779_v36 = vstv %s778_s26  ;;  %p1838_p10 = pnand %p1837_p9, %p1831_p6 }
 0x15a   :  { %846 = vrot.lane.b32.xlu1 %v844_v52, %s1865_s18  ;;  %v433_v52 = vsel %vm272_vm4, 0.0, %v2256_v2  ;;  %v383_v2 = vmul.f32 %v381_v47, %v2121_v48  ;;  %v781_v13 = vmul.f32 %v779_v36, %v2364_v17  ;;  %v2525_v47 = vpop.permute.xlu1 %304 }
 0x15b   :  { %848 = vrot.lane.b32.xlu0 %v845_v42, %s1865_s18  ;;  %v438_v42 = vrot.slane %v434_v12, 7 }
 0x15c   :  { %v387_v40 = vrot.slane %v383_v2, 2 }
 0x15e   :  { %876 = vrot.lane.b32.xlu1 %v874_v18, %s1866_s19  ;;  %v442_v18 = vsel %vm284_vm6, 0.0, %v438_v42 }
 0x15f   :  { %878 = vrot.lane.b32.xlu0 %v875_v7, %s1866_s19  ;;  %v398_v7 = vmul.f32 %v397_v1, %v2109_v53  ;;  %v2487_v56 = vsel %vm287_vm7, %v442_v18, 0.0 }
 0x160   :  { %v494_v49 = vmul.f32 %v493_v46, %v2487_v56 }
 0x162   :  { %892 = vrot.lane.b32.xlu1 %v890_v10, %s1866_s19  ;;  %v399_v10 = vmul.f32 %v397_v1, %v2121_v48 }
 0x163   :  { %894 = vrot.lane.b32.xlu0 %v891_v21, %s1866_s19  ;;  %v402_v21 = vrot.slane %v398_v7, 2 }
 0x164   :  { %v403_v62 = vrot.slane %v399_v10, 2 }
 0x166   :  { %1046 = vrot.lane.b32.xlu1 %v1042_v6, %s1865_s18  ;;  %v454_v6 = vmul.f32 %v453_v55, %v2487_v56 }
 0x167   :  { %1048 = vrot.lane.b32.xlu0 %v1043_v25, %s1865_s18 }
 0x16a   :  { %1062 = vrot.lane.b32.xlu1 %v1060_v41, %s1865_s18  ;;  %v468_v41 = vmul.f32 %v467_v5, %v2487_v56 }
 0x16b   :  { %1064 = vrot.lane.b32.xlu0 %v1061_v22, %s1865_s18 }
 0x16e   :  { %1078 = vrot.lane.b32.xlu1 %v1076_v24, %s1865_s18  ;;  %v498_v24 = vrot.slane %v494_v49, 1 }
 0x16f   :  { %1080 = vrot.lane.b32.xlu0 %v1077_v19, %s1865_s18  ;;  %v510_v19 = vmul.f32 %v509_v39, %v2487_v56 }
 0x171   :  { %v514_v3 = vrot.slane %v510_v19, 1 }
 0x172   :  { %1092 = vrot.lane.b32.xlu1 %v1088_v16, %s1866_s19  ;;  %v537_v16 = vstv %s1693_s23 }
 0x173   :  { %1094 = vrot.lane.b32.xlu0 %v1089_v44, %s1866_s19  ;;  %v538_v44 = vmul.f32 %v537_v16, %v2487_v56 }
 0x175   :  { %v542_v26 = vrot.slane %v538_v44, 2 }
 0x176   :  { %1108 = vrot.lane.b32.xlu1 %v1106_v60, %s1866_s19  ;;  %v553_v60 = vstv %s1694_s24 }
 0x177   :  { %1110 = vrot.lane.b32.xlu0 %v1107_v57, %s1866_s19  ;;  %v554_v57 = vmul.f32 %v553_v60, %v2487_v56 }
 0x17a   :  { %1124 = vrot.lane.b32.xlu1 %v1122_v35, %s1866_s19  ;;  %v558_v35 = vrot.slane %v554_v57, 2 }
 0x17b   :  { %1126 = vrot.lane.b32.xlu0 %v1123_v30, %s1866_s19 }
 0x17e   :  { %318 = vrot.lane.b32.xlu1 %v2125_v50, %s1866_s19  ;;  %v435_v50 = vsel %vm275_vm5, %v433_v52, 0.0 }
 0x17f   :  { %344 = vrot.lane.b32.xlu0 %v342_v34, %s1865_s18  ;;  %v439_v58 = vrot.slane %v435_v50, 7  ;;  %v785_v34 = vstv %s1697_s27  ;;  %v797_v50 = vstv %s1698_s28 }
 0x180   :  { %v787_v12 = vmul.f32 %v785_v34, %v2364_v17  ;;  %v786_v8 = vmul.f32 %v785_v34, %v2359_v4  ;;  %v799_v2 = vmul.f32 %v797_v50, %v2364_v17 }
 0x181   :  { %v443_v14 = vsel %vm284_vm6, 0.0, %v439_v58 }
 0x182   :  { %346 = vrot.lane.b32.xlu1 %v343_v63, %s1865_s18  ;;  %v2496_v25 = vsel %vm287_vm7, %v443_v14, 0.0  ;;  %v661_v63 = vstv %s2664_s4  ;;  %v791_v42 = vrot.slane %v787_v12, 1  ;;  %v790_v7 = vrot.slane %v786_v8, 1  ;;  %s1706_s4 = sld [smem:[#allocation9 + $0xa]] }
 0x183   :  { %360 = vrot.lane.b32.xlu0 %v358_v9, %s1866_s19  ;;  %v455_v22 = vmul.f32 %v453_v55, %v2496_v25  ;;  %v469_v0 = vmul.f32 %v467_v5, %v2496_v25  ;;  %v495_v11 = vmul.f32 %v493_v46, %v2496_v25  ;;  %v511_v23 = vmul.f32 %v509_v39, %v2496_v25 }
 0x184   :  { %v539_v27 = vmul.f32 %v537_v16, %v2496_v25  ;;  %v555_v32 = vmul.f32 %v553_v60, %v2496_v25  ;;  %v783_v15 = vadd.f32 %v781_v13, %v661_v63  ;;  %v780_v9 = vmul.f32 %v779_v36, %v2359_v4 }
 0x185   :  { %v499_v59 = vrot.slane %v495_v11, 1  ;;  %v515_v45 = vrot.slane %v511_v23, 1  ;;  %v803_v10 = vrot.slane %v799_v2, 2 }
 0x186   :  { %362 = vrot.lane.b32.xlu1 %v359_v54, %s1866_s19  ;;  %v543_v30 = vrot.slane %v539_v27, 2  ;;  %v559_v38 = vrot.slane %v555_v32, 2  ;;  %v795_v18 = vadd.f32 %v791_v42, %v783_v15 }
 0x187   :  { %388 = vrot.lane.b32.xlu0 %v386_v61, %s1865_s18  ;;  %v782_v61 = vadd.f32 %v780_v9, %v661_v63 }
 0x188   :  { %v807_v14 = vadd.f32 %v803_v10, %v795_v18 }
 0x189   :  { %v794_v55 = vadd.f32 %v790_v7, %v782_v61 }
 0x18a   :  { %390 = vrot.lane.b32.xlu1 %v387_v40, %s1865_s18 }
 0x18b   :  { %404 = vrot.lane.b32.xlu0 %v402_v21, %s1866_s19  ;;  %v798_v21 = vmul.f32 %v797_v50, %v2359_v4 }
 0x18d   :  { %v802_v46 = vrot.slane %v798_v21, 2 }
 0x18e   :  { %406 = vrot.lane.b32.xlu1 %v403_v62, %s1866_s19 }
 0x18f   :  { %458 = vrot.lane.b32.xlu0 %v454_v6, %s1865_s18 }
 0x192   :  { %460 = vrot.lane.b32.xlu1 %v455_v22, %s1865_s18 }
 0x193   :  { %472 = vrot.lane.b32.xlu0 %v468_v41, %s1866_s19  ;;  %v806_v41 = vadd.f32 %v802_v46, %v794_v55 }
 0x196   :  { %474 = vrot.lane.b32.xlu1 %v469_v0, %s1866_s19 }
 0x197   :  { %500 = vrot.lane.b32.xlu0 %v498_v24, %s1865_s18 }
 0x19a   :  { %502 = vrot.lane.b32.xlu1 %v499_v59, %s1865_s18 }
 0x19b   :  { %516 = vrot.lane.b32.xlu0 %v514_v3, %s1866_s19  ;;  %v1017_v3 = vstv %s1706_s4 }
 0x19c   :  { %v1019_v23 = vmul.f32 %v1017_v3, %v2430_v31  ;;  %v1018_v36 = vmul.f32 %v1017_v3, %v2427_v51 }
 0x19e   :  { %518 = vrot.lane.b32.xlu1 %v515_v45, %s1866_s19  ;;  %v1029_v45 = vstv %s1707_s7  ;;  %v1023_v33 = vrot.slane %v1019_v23, 1 }
 0x19f   :  { %544 = vrot.lane.b32.xlu0 %v542_v26, %s1865_s18  ;;  %v1030_v9 = vmul.f32 %v1029_v45, %v2427_v51 }
 0x1a1   :  { %v1034_v61 = vrot.slane %v1030_v9, 2 }
 0x1a2   :  { %546 = vrot.lane.b32.xlu1 %v543_v30, %s1865_s18  ;;  %v1031_v30 = vmul.f32 %v1029_v45, %v2430_v31 }
 0x1a3   :  { %560 = vrot.lane.b32.xlu0 %v558_v35, %s1866_s19 }
 0x1a4   :  { %v1035_v42 = vrot.slane %v1031_v30, 2 }
 0x1a6   :  { %562 = vrot.lane.b32.xlu1 %v559_v38, %s1866_s19  ;;  %s1705_s19 = sld [smem:[#allocation9 + $0x9]] }
 0x1ac   :  { %v1011_v26 = vstv %s1705_s19 }
 0x1ad   :  { %v1013_v27 = vmul.f32 %v1011_v26, %v2430_v31  ;;  %v1012_v34 = vmul.f32 %v1011_v26, %v2427_v51 }
 0x1c2   :  { %v2527_v52 = vpop.xlane.xlu0 %1228 }
 0x1c6   :  { %v2534_v1 = vpop.xlane.xlu1 %1231  ;;  %v817_v54 = vpop.permute.xlu0 %816 }
 0x1c7   :  { %v821_v5 = vadd.f32 %v817_v54, %v807_v14  ;;  %v1022_v54 = vrot.slane %v1018_v36, 1  ;;  %v1234_v21 = vmul.f32 0.0625, %v2534_v1 }
 0x1ca   :  { %v815_v58 = vpop.permute.xlu1 %814  ;;  %v863_v40 = vpop.permute.xlu0 %862 }
 0x1cb   :  { %v820_v39 = vadd.f32 %v815_v58, %v806_v41  ;;  %v1233_v58 = vmul.f32 0.0625, %v2527_v52 }
 0x1cd   :  { %v1237_v51 = vrot.slane %v1233_v58, 7 }
 0x1ce   :  { %v861_v6 = vpop.permute.xlu1 %860  ;;  %v833_v62 = vpop.permute.xlu0 %832 }
 0x1cf   :  { %v837_v49 = vadd.f32 %v833_v62, %v821_v5  ;;  %v1238_v62 = vrot.slane %v1234_v21, 7  ;;  %v1241_v46 = vsel %vm284_vm6, 0.0, %v1237_v51 }
 0x1d1   :  { %v1242_v1 = vsel %vm284_vm6, 0.0, %v1238_v62 }
 0x1d2   :  { %v831_v22 = vpop.permute.xlu1 %830  ;;  %v849_v17 = vpop.permute.xlu0 %848 }
 0x1d3   :  { %v853_v24 = vadd.f32 %v849_v17, %v837_v49  ;;  %v836_v19 = vadd.f32 %v831_v22, %v820_v39  ;;  %v1252_v22 = vstv %s1716_s9  ;;  %v1243_v17 = vsel %vm287_vm7, %v1241_v46, 0.0 }
 0x1d5   :  { %v867_v0 = vadd.f32 %v863_v40, %v853_v24  ;;  %v369_v24 = vstv %s2546_s8 }
 0x1d6   :  { %v847_v11 = vpop.permute.xlu1 %846  ;;  %v879_v16 = vpop.permute.xlu0 %878  ;;  %v370_v23 = vmul.f32 %v369_v24, %v2109_v53  ;;  %v371_v21 = vmul.f32 %v369_v24, %v2121_v48 }
 0x1d7   :  { %v852_v4 = vadd.f32 %v847_v11, %v836_v19  ;;  %v883_v44 = vadd.f32 %v879_v16, %v867_v0  ;;  %v293_v19 = vmul.f32 %v291_v28, %v2121_v48  ;;  %v1244_v0 = vsel %vm287_vm7, %v1242_v1, 0.0 }
 0x1d9   :  { %v866_v59 = vadd.f32 %v861_v6, %v852_v4 }
 0x1da   :  { %v877_v60 = vpop.permute.xlu1 %876  ;;  %v895_v57 = vpop.permute.xlu0 %894 }
 0x1db   :  { %v899_v35 = vadd.f32 %v895_v57, %v883_v44  ;;  %v882_v32 = vadd.f32 %v877_v60, %v866_v59  ;;  %v1253_v44 = vmul.f32 %v1252_v22, %v1243_v17  ;;  %v327_v59 = vmul.f32 %v325_v43, %v2121_v48 }
 0x1dc   :  { %v1254_v60 = vmul.f32 %v1252_v22, %v1244_v0  ;;  %v295_v57 = vadd.f32 %v293_v19, %v247_v37  ;;  %v374_v43 = vrot.slane %v370_v23, 2 }
 0x1dd   :  { %v1015_v38 = vadd.f32 %v1013_v27, %v899_v35  ;;  %v1246_v27 = vstv %s2548_s10  ;;  %v1264_v35 = vstv %s2551_s11  ;;  %v331_v36 = vrot.slane %v327_v59, 1 }
 0x1de   :  { %v893_v13 = vpop.permute.xlu1 %892  ;;  %v1049_v12 = vpop.permute.xlu0 %1048  ;;  %v1266_v37 = vmul.f32 %v1264_v35, %v1244_v0 }
 0x1df   :  { %v898_v63 = vadd.f32 %v893_v13, %v882_v32  ;;  %v1027_v15 = vadd.f32 %v1023_v33, %v1015_v38  ;;  %v309_v38 = vadd.f32 %v2525_v47, %v295_v57  ;;  %v1257_v33 = vrot.slane %v1253_v44, 1 }
 0x1e1   :  { %v1014_v8 = vadd.f32 %v1012_v34, %v898_v63  ;;  %v1039_v50 = vadd.f32 %v1035_v42, %v1027_v15  ;;  %v1258_v34 = vrot.slane %v1254_v60, 1  ;;  %v1247_v63 = vmul.f32 %v1246_v27, %v1243_v17 }
 0x1e2   :  { %v1047_v2 = vpop.permute.xlu1 %1046  ;;  %v1065_v18 = vpop.permute.xlu0 %1064  ;;  %v1265_v15 = vmul.f32 %v1264_v35, %v1243_v17  ;;  %v1248_v42 = vmul.f32 %v1246_v27, %v1244_v0 }
 0x1e3   :  { %v1026_v31 = vadd.f32 %v1022_v54, %v1014_v8  ;;  %v1053_v49 = vadd.f32 %v1049_v12, %v1039_v50 }
 0x1e4   :  { %v1269_v58 = vrot.slane %v1265_v15, 2 }
 0x1e5   :  { %v1038_v7 = vadd.f32 %v1034_v61, %v1026_v31  ;;  %v1069_v4 = vadd.f32 %v1065_v18, %v1053_v49  ;;  %v1262_v18 = vadd.f32 %v1258_v34, %v1248_v42  ;;  %v375_v49 = vrot.slane %v371_v21, 2 }
 0x1e6   :  { %v1063_v40 = vpop.permute.xlu1 %1062  ;;  %v1081_v10 = vpop.permute.xlu0 %1080 }
 0x1e7   :  { %v1052_v14 = vadd.f32 %v1047_v2, %v1038_v7  ;;  %v1085_v30 = vadd.f32 %v1081_v10, %v1069_v4  ;;  %v1261_v2 = vadd.f32 %v1257_v33, %v1247_v63  ;;  %v1270_v10 = vrot.slane %v1266_v37, 2 }
 0x1e9   :  { %v1068_v5 = vadd.f32 %v1063_v40, %v1052_v14  ;;  %v1273_v14 = vadd.f32 %v1269_v58, %v1261_v2  ;;  %v1274_v51 = vadd.f32 %v1270_v10, %v1262_v18  ;;  %v2590_v18 = vsub.s32 0, %v2160_v20 }
 0x1ea   :  { %v1079_v55 = vpop.permute.xlu1 %1078  ;;  %v1095_v6 = vpop.permute.xlu0 %1094 }
 0x1eb   :  { %v1084_v39 = vadd.f32 %v1079_v55, %v1068_v5  ;;  %v1099_v53 = vadd.f32 %v1095_v6, %v1085_v30  ;;  %v1718_v17 = vmul.f32 -1.442695, %v1273_v14  ;;  %v1350_v14 = vsub.s32 1, %v2160_v20 }
 0x1ee   :  { %v1093_v52 = vpop.permute.xlu1 %1092  ;;  %v1111_v41 = vpop.permute.xlu0 %1110 }
 0x1ef   :  { %v1098_v3 = vadd.f32 %v1093_v52, %v1084_v39  ;;  %v1115_v50 = vadd.f32 %v1111_v41, %v1099_v53  ;;  %v447_v52 = vstv %s2572_s2  ;;  %v1719_v39 = vmul.f32 -1.442695, %v1274_v51 }
 0x1f0   :  { %v448_v22 = vmul.f32 %v447_v52, %v2487_v56 }
 0x1f2   :  { %v1109_v11 = vpop.permute.xlu1 %1108  ;;  %v1127_v16 = vpop.permute.xlu0 %1126 }
 0x1f3   :  { %v1114_v26 = vadd.f32 %v1109_v11, %v1098_v3  ;;  %v1131_v31 = vadd.f32 %v1127_v16, %v1115_v50  ;;  %v481_v11 = vstv %s2574_s20 }
 0x1f4   :  { %v482_v16 = vmul.f32 %v481_v11, %v2487_v56  ;;  %v483_v33 = vmul.f32 %v481_v11, %v2496_v25 }
 0x1f5   :  { %v1715_v55 = vmul.f32 -1.442695, %v1131_v31 }
 0x1f6   :  { %v1125_v28 = vpop.permute.xlu1 %1124  ;;  %v345_v45 = vpop.permute.xlu0 %344  ;;  %v487_v42 = vrot.slane %v483_v33, 1 }
 0x1f7   :  { %v1130_v32 = vadd.f32 %v1125_v28, %v1114_v26  ;;  %v350_v12 = vadd.f32 %v345_v45, %v2389_v29  ;;  %v449_v26 = vmul.f32 %v447_v52, %v2496_v25  ;;  %v486_v45 = vrot.slane %v482_v16, 1 }
 0x1f9   :  { %v1714_v13 = vmul.f32 -1.442695, %v1130_v32 }
 0x1fa   :  { %v319_v9 = vpop.permute.xlu1 %318  ;;  %v361_v8 = vpop.permute.xlu0 %360 }
 0x1fb   :  { %1734 = vpow2.f32 %v1714_v13  ;;  %v323_v54 = vadd.f32 %v319_v9, %v309_v38  ;;  %v366_v47 = vadd.f32 %v361_v8, %v350_v12  ;;  %v525_v38 = vstv %s2580_s25 }
 0x1fc   :  { %1736 = vpow2.f32 %v1715_v55 }
 0x1fd   :  { %v335_v61 = vadd.f32 %v331_v36, %v323_v54  ;;  %v378_v7 = vadd.f32 %v374_v43, %v366_v47  ;;  %1738 = vpow2.f32 %v1718_v17  ;;  %v526_v36 = vmul.f32 %v525_v38, %v2487_v56 }
 0x1fe   :  { %v347_v29 = vpop.permute.xlu1 %346  ;;  %v389_v40 = vpop.permute.xlu0 %388  ;;  %1740 = vpow2.f32 %v1719_v39  ;;  %v527_v56 = vmul.f32 %v525_v38, %v2496_v25  ;;  %v1361_v25 = vsub.s32 2, %v2160_v20 }
 0x1ff   :  { %v351_v6 = vadd.f32 %v347_v29, %v335_v61  ;;  %v394_v62 = vadd.f32 %v389_v40, %v378_v7  ;;  %v530_v37 = vrot.slane %v526_v36, 2 }
 0x200   :  { %v531_v21 = vrot.slane %v527_v56, 2 }
 0x202   :  { %v363_v5 = vpop.permute.xlu1 %362  ;;  %v405_v46 = vpop.permute.xlu0 %404 }
 0x203   :  { %v367_v41 = vadd.f32 %v363_v5, %v351_v6  ;;  %v410_v1 = vadd.f32 %v405_v46, %v394_v62  ;;  %v1868_v6 = vmov 1966171168   ;;  %v1372_v46 = vsub.s32 3, %v2160_v20 }
 0x204   :  { %v1290_v62 = vunpack.c.l.s4 %v1868_v6 }
 0x205   :  { %v379_v19 = vadd.f32 %v375_v49, %v367_v41  ;;  %v450_v0 = vadd.f32 %v448_v22, %v410_v1 }
 0x206   :  { %v391_v48 = vpop.permute.xlu1 %390  ;;  %v459_v24 = vpop.permute.xlu0 %458  ;;  %v1291_v52 = vunpack.c.0.s8 %v1290_v62 }
 0x207   :  { %v395_v44 = vadd.f32 %v391_v48, %v379_v19  ;;  %v464_v59 = vadd.f32 %v459_v24, %v450_v0 }
 0x208   :  { %v1735_v4 = vpop.eup %1734  ;;  %v2600_v49 = vsub.s32 %v1291_v52, %v2160_v20 }
 0x209   :  { %v1138_v3 = vadd.f32 1.0, %v1735_v4  ;;  %v1737_v53 = vpop.eup %1736 }
 0x20a   :  { %v407_v23 = vpop.permute.xlu1 %406  ;;  %v473_v60 = vpop.permute.xlu0 %472  ;;  %v1139_v8 = vadd.f32 1.0, %v1737_v53 }
 0x20b   :  { %1742 = vrcp.f32 %v1138_v3  ;;  %v411_v57 = vadd.f32 %v407_v23, %v395_v44  ;;  %v478_v28 = vadd.f32 %v473_v60, %v464_v59  ;;  %v1739_v9 = vpop.eup %1738 }
 0x20c   :  { %v1741_v47 = vpop.eup %1740  ;;  %v1281_v61 = vadd.f32 1.0, %v1739_v9  ;;  %1744 = vrcp.f32 %v1139_v8 }
 0x20d   :  { %v451_v27 = vadd.f32 %v449_v26, %v411_v57  ;;  %v490_v35 = vadd.f32 %v486_v45, %v478_v28  ;;  %v1282_v7 = vadd.f32 1.0, %v1741_v47 }
 0x20e   :  { %v461_v30 = vpop.permute.xlu1 %460  ;;  %v501_v32 = vpop.permute.xlu0 %500  ;;  %1746 = vrcp.f32 %v1281_v61 }
 0x20f   :  { %v465_v43 = vadd.f32 %v461_v30, %v451_v27  ;;  %v506_v34 = vadd.f32 %v501_v32, %v490_v35  ;;  %1748 = vrcp.f32 %v1282_v7 }
 0x212   :  { %v475_v13 = vpop.permute.xlu1 %474  ;;  %v517_v12 = vpop.permute.xlu0 %516 }
 0x213   :  { %v479_v63 = vadd.f32 %v475_v13, %v465_v43  ;;  %v522_v15 = vadd.f32 %v517_v12, %v506_v34 }
 0x215   :  { %v491_v50 = vadd.f32 %v487_v42, %v479_v63  ;;  %v2587_v54 = vadd.f32 %v530_v37, %v522_v15 }
 0x216   :  { %v503_v2 = vpop.permute.xlu1 %502  ;;  %v545_v36 = vpop.permute.xlu0 %544 }
 0x217   :  { %v507_v58 = vadd.f32 %v503_v2, %v491_v50  ;;  %v550_v53 = vadd.f32 %v545_v36, %v2587_v54 }
 0x218   :  { %v1743_v31 = vpop.eup %1742 }
 0x219   :  { %v1340_v29 = vrot.slane %v1743_v31, %v2590_v18  ;;  %v1351_v55 = vrot.slane %v1743_v31, %v1350_v14  ;;  %v1362_v5 = vrot.slane %v1743_v31, %v1361_v25  ;;  %v1373_v41 = vrot.slane %v1743_v31, %v1372_v46  ;;  %v1745_v1 = vpop.eup %1744 }
 0x21a   :  { %v519_v40 = vpop.permute.xlu1 %518  ;;  %v1384_v17 = vrot.slane %v1745_v1, %v2590_v18  ;;  %v1395_v0 = vrot.slane %v1745_v1, %v1350_v14  ;;  %v1406_v11 = vrot.slane %v1745_v1, %v1361_v25  ;;  %v1417_v33 = vrot.slane %v1745_v1, %v1372_v46  ;;  %v561_v34 = vpop.permute.xlu0 %560 }
 0x21b   :  { %v523_v10 = vadd.f32 %v519_v40, %v507_v58  ;;  %1346 = vbcast.lane.b32.xlu1 %v1340_v29, 264  ;;  %1342 = vbcast.lane.b32.xlu0 %v1340_v29, 256  ;;  %v1747_v22 = vpop.eup %1746  ;;  %v566_v12 = vadd.f32 %v561_v34, %v550_v53 }
 0x21c   :  { %v1749_v39 = vpop.eup %1748  ;;  %v1505_v19 = vrot.slane %v1747_v22, %v2600_v49 }
 0x21d   :  { %v2595_v51 = vadd.f32 %v531_v21, %v523_v10  ;;  %v1529_v48 = vrot.slane %v1749_v39, %v2600_v49  ;;  %v1695_v42 = vmul.f32 -1.442695, %v566_v12 }
 0x21e   :  { %v1513_v24 = vrot.slane %v1505_v19, %v2600_v49  ;;  %v1506_v20 = vcombine.high %v1505_v19, %v1505_v19  ;;  %v547_v43 = vpop.permute.xlu1 %546 }
 0x21f   :  { %1357 = vbcast.lane.b32.xlu1 %v1351_v55, 264  ;;  %1353 = vbcast.lane.b32.xlu0 %v1351_v55, 256  ;;  %v1537_v16 = vrot.slane %v1529_v48, %v2600_v49  ;;  %v1530_v4 = vcombine.high %v1529_v48, %v1529_v48  ;;  %v551_v63 = vadd.f32 %v547_v43, %v2595_v51  ;;  %1750 = vpow2.f32 %v1695_v42 }
 0x220   :  { %v1550_v44 = vrot.slane %v1513_v24, %v2590_v18  ;;  %v1520_v59 = vrot.slane %v1506_v20, %v2600_v49  ;;  %v1521_v57 = vcombine.high %v1513_v24, %v1513_v24 }
 0x221   :  { %v1566_v3 = vrot.slane %v1537_v16, %v2590_v18  ;;  %v1544_v23 = vrot.slane %v1530_v4, %v2600_v49  ;;  %v1545_v35 = vcombine.high %v1537_v16, %v1537_v16 }
 0x222   :  { %v1554_v60 = vrot.slane %v1520_v59, %v2590_v18  ;;  %v1522_v28 = vcombine.high %v1520_v59, %v1520_v59  ;;  %v1558_v45 = vrot.slane %v1521_v57, %v2590_v18  ;;  %v563_v13 = vpop.permute.xlu1 %562 }
 0x223   :  { %1368 = vbcast.lane.b32.xlu1 %v1362_v5, 264  ;;  %1364 = vbcast.lane.b32.xlu0 %v1362_v5, 256  ;;  %v1570_v26 = vrot.slane %v1544_v23, %v2590_v18  ;;  %v1546_v30 = vcombine.high %v1544_v23, %v1544_v23  ;;  %v1574_v32 = vrot.slane %v1545_v35, %v2590_v18 }
 0x224   :  { %v1562_v27 = vrot.slane %v1522_v28, %v2590_v18  ;;  %v567_v15 = vadd.f32 %v563_v13, %v551_v63 }
 0x225   :  { %v1578_v38 = vrot.slane %v1546_v30, %v2590_v18 }
 0x226   :  { %v1696_v37 = vmul.f32 -1.442695, %v567_v15 }
 0x227   :  { %1379 = vbcast.lane.b32.xlu1 %v1373_v41, 264  ;;  %1375 = vbcast.lane.b32.xlu0 %v1373_v41, 256 }
 0x228   :  { %1752 = vpow2.f32 %v1696_v37 }
 0x22b   :  { %1390 = vbcast.lane.b32.xlu1 %v1384_v17, 264  ;;  %1386 = vbcast.lane.b32.xlu0 %v1384_v17, 256 }
 0x22c   :  { %v1751_v9 = vpop.eup %1750 }
 0x22d   :  { %v574_v50 = vadd.f32 1.0, %v1751_v9  ;;  %v1758_v9 = vld [vmem:[#allocation4 + $0x40] sm:$0xff] }
 0x22f   :  { %1397 = vbcast.lane.b32.xlu1 %v1395_v0, 256  ;;  %1401 = vbcast.lane.b32.xlu0 %v1395_v0, 264  ;;  %1754 = vrcp.f32 %v574_v50  ;;  %v1759_v50 = vld [vmem:[#allocation4 + $0x48] sm:$0xff] }
 0x233   :  { %1408 = vbcast.lane.b32.xlu1 %v1406_v11, 256  ;;  %1412 = vbcast.lane.b32.xlu0 %v1406_v11, 264 }
 0x235   :  { %v1753_v8 = vpop.eup %1752 }
 0x236   :  { %v575_v56 = vadd.f32 1.0, %v1753_v8 }
 0x237   :  { %1596 = vperm.xlu1 %1733, %v1566_v3   ;;  %1580 = vperm.xlu0 %1732, %v1550_v44  }
 0x238   :  { %1756 = vrcp.f32 %v575_v56 }
 0x23b   :  { %1584 = vperm.xlu1 %1733, %v1554_v60   ;;  %1600 = vperm.xlu0 %1732, %v1570_v26  }
 0x23c   :  { %v1755_v40 = vpop.eup %1754 }
 0x23d   :  { %v1295_v21 = vrot.slane %v1755_v40, %v2600_v49 }
 0x23f   :  { %1588 = vperm.xlu1 %1733, %v1558_v45   ;;  %1592 = vperm.xlu0 %1732, %v1562_v27   ;;  %v1296_v25 = vcombine.high %v1295_v21, %v1295_v21  ;;  %v1303_v62 = vrot.slane %v1295_v21, %v2600_v49 }
 0x241   :  { %v1310_v46 = vrot.slane %v1296_v25, %v2600_v49  ;;  %v1428_v22 = vrot.slane %v1303_v62, %v2590_v18  ;;  %v1311_v17 = vcombine.high %v1303_v62, %v1303_v62 }
 0x243   :  { %1604 = vperm.xlu1 %1733, %v1574_v32   ;;  %1608 = vperm.xlu0 %1732, %v1578_v38   ;;  %v1432_v19 = vrot.slane %v1310_v46, %v2590_v18  ;;  %v1312_v0 = vcombine.high %v1310_v46, %v1310_v46  ;;  %v1436_v59 = vrot.slane %v1311_v17, %v2590_v18 }
 0x245   :  { %v1757_v10 = vpop.eup %1756  ;;  %v1440_v23 = vrot.slane %v1312_v0, %v2590_v18 }
 0x246   :  { %v1319_v14 = vrot.slane %v1757_v10, %v2600_v49 }
 0x247   :  { %1419 = vbcast.lane.b32.xlu1 %v1417_v33, 256  ;;  %1423 = vbcast.lane.b32.xlu0 %v1417_v33, 264 }
 0x248   :  { %v1320_v6 = vcombine.high %v1319_v14, %v1319_v14  ;;  %v1327_v5 = vrot.slane %v1319_v14, %v2600_v49 }
 0x24a   :  { %v2625_v1 = vrot.slane %v1320_v6, %v2600_v49  ;;  %v1444_v39 = vrot.slane %v1327_v5, %v2590_v18  ;;  %v1335_v57 = vcombine.high %v1327_v5, %v1327_v5  ;;  %v1762_v5 = vld [vmem:[#allocation4 + $0x10] sm:$0xff] }
 0x24c   :  { %v1448_v3 = vrot.slane %v2625_v1, %v2590_v18  ;;  %v1452_v40 = vrot.slane %v1335_v57, %v2590_v18 }
 0x28d   :  { %v1347_v47 = vpop.permute.xlu1 %1346  ;;  %v1343_v2 = vpop.permute.xlu0 %1342 }
 0x28e   :  { %v1466_v48 = vadd.f32 %v1428_v22, %v1347_v47  ;;  %v1465_v24 = vadd.f32 %v1428_v22, %v1343_v2  ;;  %v1760_v2 = vld [vmem:[#allocation4] sm:$0xff]  ;;  %v1764_v22 = vld [vmem:[#allocation4 + $0x50] sm:$0xff] }
 0x290   :  { %v1482_v28 = vmul.f32 0.5, %v1466_v48  ;;  %v1481_v45 = vmul.f32 0.5, %v1465_v24 }
 0x291   :  { %v1358_v31 = vpop.permute.xlu1 %1357  ;;  %v1354_v61 = vpop.permute.xlu0 %1353 }
 0x292   :  { %v1468_v20 = vadd.f32 %v1432_v19, %v1358_v31  ;;  %v1467_v4 = vadd.f32 %v1432_v19, %v1354_v61  ;;  %v1761_v31 = vld [vmem:[#allocation4 + $0x8] sm:$0xff] }
 0x294   :  { %v1484_v30 = vmul.f32 0.5, %v1468_v20  ;;  %v1483_v32 = vmul.f32 0.5, %v1467_v4 }
 0x295   :  { %v1369_v54 = vpop.permute.xlu1 %1368  ;;  %v1365_v7 = vpop.permute.xlu0 %1364 }
 0x296   :  { %v1470_v38 = vadd.f32 %v1436_v59, %v1369_v54  ;;  %v1469_v33 = vadd.f32 %v1436_v59, %v1365_v7 }
 0x298   :  { %v1486_v54 = vmul.f32 0.5, %v1470_v38  ;;  %v1485_v7 = vmul.f32 0.5, %v1469_v33  ;;  %v1771_v33 = vld [vmem:[#allocation4 + $0x68] sm:$0xff] }
 0x299   :  { %v1380_v58 = vpop.permute.xlu1 %1379  ;;  %v1376_v29 = vpop.permute.xlu0 %1375 }
 0x29a   :  { %v1472_v63 = vadd.f32 %v1440_v23, %v1380_v58  ;;  %v1471_v15 = vadd.f32 %v1440_v23, %v1376_v29  ;;  %v1767_v23 = vld [vmem:[#allocation4 + $0x28] sm:$0xff] }
 0x29c   :  { %v1487_v25 = vmul.f32 0.5, %v1471_v15 }
 0x29d   :  { %v1391_v51 = vpop.permute.xlu1 %1390  ;;  %v1387_v55 = vpop.permute.xlu0 %1386 }
 0x29e   :  { %v1474_v11 = vadd.f32 %v1444_v39, %v1391_v51  ;;  %v1473_v16 = vadd.f32 %v1444_v39, %v1387_v55  ;;  %v1488_v55 = vmul.f32 0.5, %v1472_v63  ;;  %v1765_v39 = vld [vmem:[#allocation4 + $0x58] sm:$0xff] }
 0x2a0   :  { %v1490_v27 = vmul.f32 0.5, %v1474_v11  ;;  %v1489_v35 = vmul.f32 0.5, %v1473_v16 }
 0x2a1   :  { %v1398_v52 = vpop.permute.xlu1 %1397  ;;  %v1402_v41 = vpop.permute.xlu0 %1401 }
 0x2a2   :  { %v1475_v60 = vadd.f32 %v1448_v3, %v1398_v52  ;;  %v1476_v26 = vadd.f32 %v1448_v3, %v1402_v41  ;;  %v1763_v52 = vld [vmem:[#allocation4 + $0x18] sm:$0xff] }
 0x2a4   :  { %v1491_v42 = vmul.f32 0.5, %v1475_v60  ;;  %v1492_v37 = vmul.f32 0.5, %v1476_v26  ;;  %v1768_v26 = vld [vmem:[#allocation4 + $0x30] sm:$0xff] }
 0x2a5   :  { %v1409_v44 = vpop.permute.xlu1 %1408  ;;  %v1413_v49 = vpop.permute.xlu0 %1412 }
 0x2a6   :  { %v1477_v6 = vadd.f32 %v1452_v40, %v1409_v44  ;;  %v1478_v62 = vadd.f32 %v1452_v40, %v1413_v49  ;;  %v1336_v44 = vcombine.high %v2625_v1, %v2625_v1  ;;  %v1766_v49 = vld [vmem:[#allocation4 + $0x20] sm:$0xff] }
 0x2a8   :  { %v1493_v4 = vmul.f32 0.5, %v1477_v6  ;;  %v1494_v3 = vmul.f32 0.5, %v1478_v62 }
 0x2b2   :  { %v1597_v36 = vpop.permute.xlu1 %1596  ;;  %v1581_v43 = vpop.permute.xlu0 %1580 }
 0x2b3   :  { %v1619_v34 = vadd.f32 %v1597_v36, %v1489_v35  ;;  %v1620_v53 = vadd.f32 %v1597_v36, %v1490_v27  ;;  %v1611_v13 = vadd.f32 %v1581_v43, %v1481_v45  ;;  %v1612_v12 = vadd.f32 %v1581_v43, %v1482_v28  ;;  %v1769_v28 = vld [vmem:[#allocation4 + $0x38] sm:$0xff] }
 0x2b4   :  { %v1456_v43 = vrot.slane %v1336_v44, %v2590_v18 }
 0x2b5   :  { %v1635_v8 = vmul.f32 %v1758_v9, %v1619_v34  ;;  %v1636_v47 = vmul.f32 %v1759_v50, %v1620_v53  ;;  %v1627_v56 = vmul.f32 %v1760_v2, %v1611_v13  ;;  %v1628_v61 = vmul.f32 %v1761_v31, %v1612_v12  ;;  %v1772_v9 = vld [vmem:[#allocation4 + $0x70] sm:$0xff]  ;;  %v1773_v50 = vld [vmem:[#allocation4 + $0x78] sm:$0xff] }
 0x2b6   :  { %v1585_v10 = vpop.permute.xlu1 %1584  ;;  %v1601_v21 = vpop.permute.xlu0 %1600 }
 0x2b7   :  { %1651 = vst.msk [vmem:[#allocation12 + $0x40] sm:$0xff] %vm92_vm0, %v1635_v8  ;;  %1652 = vst.msk [vmem:[#allocation12 + $0x48] sm:$0xff] %vm92_vm0, %v1636_v47  ;;  %v1613_v58 = vadd.f32 %v1585_v10, %v1483_v32  ;;  %v1614_v29 = vadd.f32 %v1585_v10, %v1484_v30  ;;  %v1621_v14 = vadd.f32 %v1601_v21, %v1491_v42  ;;  %v1770_v32 = vld [vmem:[#allocation4 + $0x60] sm:$0xff] }
 0x2b8   :  { %1643 = vst.msk [vmem:[#allocation12] sm:$0xff] %vm92_vm0, %v1627_v56  ;;  %1644 = vst.msk [vmem:[#allocation12 + $0x8] sm:$0xff] %vm92_vm0, %v1628_v61  ;;  %v1622_v51 = vadd.f32 %v1601_v21, %v1492_v37 }
 0x2b9   :  { %v1629_v46 = vmul.f32 %v1762_v5, %v1613_v58  ;;  %v1630_v41 = vmul.f32 %v1763_v52, %v1614_v29  ;;  %v1637_v17 = vmul.f32 %v1764_v22, %v1621_v14 }
 0x2ba   :  { %v1638_v19 = vmul.f32 %v1765_v39, %v1622_v51  ;;  %v1589_v0 = vpop.permute.xlu1 %1588  ;;  %v1593_v48 = vpop.permute.xlu0 %1592 }
 0x2bb   :  { %1645 = vst.msk [vmem:[#allocation12 + $0x10] sm:$0xff] %vm92_vm0, %v1629_v46  ;;  %1646 = vst.msk [vmem:[#allocation12 + $0x18] sm:$0xff] %vm92_vm0, %v1630_v41  ;;  %v1615_v24 = vadd.f32 %v1589_v0, %v1485_v7  ;;  %v1616_v11 = vadd.f32 %v1589_v0, %v1486_v54  ;;  %v1617_v16 = vadd.f32 %v1593_v48, %v1487_v25 }
 0x2bc   :  { %1653 = vst.msk [vmem:[#allocation12 + $0x50] sm:$0xff] %vm92_vm0, %v1637_v17  ;;  %1654 = vst.msk [vmem:[#allocation12 + $0x58] sm:$0xff] %vm92_vm0, %v1638_v19  ;;  %v1618_v20 = vadd.f32 %v1593_v48, %v1488_v55 }
 0x2bd   :  { %v1631_v59 = vmul.f32 %v1766_v49, %v1615_v24  ;;  %v1632_v60 = vmul.f32 %v1767_v23, %v1616_v11  ;;  %v1633_v57 = vmul.f32 %v1768_v26, %v1617_v16 }
 0x2be   :  { %v1634_v45 = vmul.f32 %v1769_v28, %v1618_v20  ;;  %v1605_v27 = vpop.permute.xlu1 %1604  ;;  %v1609_v35 = vpop.permute.xlu0 %1608 }
 0x2bf   :  { %1647 = vst.msk [vmem:[#allocation12 + $0x20] sm:$0xff] %vm92_vm0, %v1631_v59  ;;  %1648 = vst.msk [vmem:[#allocation12 + $0x28] sm:$0xff] %vm92_vm0, %v1632_v60  ;;  %v1623_v30 = vadd.f32 %v1605_v27, %v1493_v4  ;;  %v1624_v1 = vadd.f32 %v1605_v27, %v1494_v3 }
 0x2c0   :  { %1649 = vst.msk [vmem:[#allocation12 + $0x30] sm:$0xff] %vm92_vm0, %v1633_v57  ;;  %1650 = vst.msk [vmem:[#allocation12 + $0x38] sm:$0xff] %vm92_vm0, %v1634_v45 }
 0x2c1   :  { %v1639_v38 = vmul.f32 %v1770_v32, %v1623_v30  ;;  %v1640_v36 = vmul.f32 %v1771_v33, %v1624_v1 }
 0x2c2   :  { %v1420_v34 = vpop.permute.xlu1 %1419  ;;  %v1424_v53 = vpop.permute.xlu0 %1423 }
 0x2c3   :  { %1655 = vst.msk [vmem:[#allocation12 + $0x60] sm:$0xff] %vm92_vm0, %v1639_v38  ;;  %1656 = vst.msk [vmem:[#allocation12 + $0x68] sm:$0xff] %vm92_vm0, %v1640_v36  ;;  %v1479_v13 = vadd.f32 %v1456_v43, %v1420_v34  ;;  %v1480_v12 = vadd.f32 %v1456_v43, %v1424_v53 }
 0x2c5   :  { %v1495_v63 = vmul.f32 0.5, %v1479_v13  ;;  %v1496_v15 = vmul.f32 0.5, %v1480_v12 }
 0x2c7   :  { %v1625_v42 = vadd.f32 %v1609_v35, %v1495_v63  ;;  %v1626_v37 = vadd.f32 %v1609_v35, %v1496_v15 }
 0x2c9   :  { %v1641_v8 = vmul.f32 %v1772_v9, %v1625_v42  ;;  %v1642_v47 = vmul.f32 %v1773_v50, %v1626_v37 }
 0x2cb   :  { %1657 = vst.msk [vmem:[#allocation12 + $0x70] sm:$0xff] %vm92_vm0, %v1641_v8  ;;  %1658 = vst.msk [vmem:[#allocation12 + $0x78] sm:$0xff] %vm92_vm0, %v1642_v47 }
 0x2cc   :  { %1841 = shalt.err (!%p1838_p10)
}
 0x2cd   :  { %1670 = dma.vmem_to_hbm [thread:$0]  %s1665_s15, 2048, %s2666_s6, [#allocation6], %s1860_s3, %s1860_s3, %s1861_s29  }
 0x2ce   :  { %1856 = dma.done.wait [#allocation6], 2048  }
 0x2cf   :  { %1857 = vsyncadd [#allocation6], 4294965248 }
 0x2d0   :  { %1674 = vsyncpa [#allocation5], 1 }
 0x2d1   :  { %1675 = vsyncpa [#allocation6], 1 }
 0x2d2   :  { %1676 = vsyncpa [#allocation7], 1 }
 0x2d3   :  { %1677 = vsyncpa [#allocation10], 1 }

</bundles_post_ra>
